<compile_context>
chip_gen: v6e
topology: v6e:2x2x1
jax: 0.10.0
libtpu: 0.0.40
codegen_flags: <defaults>
</compile_context>

<pallas_src>
import jax
import jax.numpy as jnp
from jax.experimental import pallas as pl
from jax.experimental.pallas import tpu as pltpu


# ------------------------- fused Pallas kernel -------------------------

def fused_kernel(x_ref, w1_ref, b1_ref, w2_ref, b2_ref, w3_ref, b3_ref, o_ref):
    """Whole BiConvNet forward for a (B, C*H*W) activation block.

    x  @ W1 + b1 : both branches' first convs  -> (B, (H+W)*2M)   LeakyReLU
       @ W2 + b2 : both branches' 1x1 convs    -> (B, (H+W)*M)    ReLU
       @ W3 + b3 : linear_h + linear_w + add   -> (B, out_dim)
    """
    a = jnp.dot(x_ref[...], w1_ref[...], preferred_element_type=jnp.float32)
    a = a + b1_ref[...]
    a = jnp.where(a > 0, a, 0.01 * a)          # LeakyReLU (torch default 0.01)
    a = jnp.dot(a, w2_ref[...], preferred_element_type=jnp.float32)
    a = a + b2_ref[...]
    a = jnp.maximum(a, 0.0)                    # ReLU
    y = jnp.dot(a, w3_ref[...], preferred_element_type=jnp.float32)
    o_ref[...] = (y + b3_ref[...]).astype(o_ref.dtype)


# ------------------------- one-time parameter prep -------------------------

def prepare_params(p, inp_dim):
    """Fold all conv/linear layouts into three dense matmul operands.

    Done once per parameter set (outside the per-step forward), so no
    transpose/reshape glue ops run per forward call.
    """
    C, H, W = inp_dim
    two_m = p['w1h'].shape[0]
    M = two_m // 2
    O = p['wlh'].shape[0]
    f32 = jnp.float32

    eye_h = jnp.eye(H, dtype=f32)
    eye_w = jnp.eye(W, dtype=f32)

    # --- first convs: (C*H*W) -> per-position features ---------------------
    # rows indexed (c, h, w) (matches state.reshape(B, C*H*W) flatten order),
    # h-branch cols indexed (h, k): W1h[(c,hp,w),(h,k)] = w1h[k,c,w]*delta(hp,h)
    W1h = jnp.einsum('kcw,ph->cpwhk', p['w1h'], eye_h).reshape(C * H * W, H * two_m)
    # w-branch cols indexed (w, k): W1w[(c,h,wp),(w,k)] = w1w[k,c,h]*delta(wp,w)
    W1w = jnp.einsum('kch,pw->chpwk', p['w1w'], eye_w).reshape(C * H * W, W * two_m)
    W1 = jnp.concatenate([W1h, W1w], axis=1)                    # (CHW, (H+W)*2M)
    b1 = jnp.concatenate([jnp.tile(p['b1h'], H),
                          jnp.tile(p['b1w'], W)]).reshape(1, -1)

    # --- 1x1 convs: block-diagonal over spatial position --------------------
    W2h = jnp.einsum('mk,ph->pkhm', p['w2h'], eye_h).reshape(H * two_m, H * M)
    W2w = jnp.einsum('mk,pw->pkwm', p['w2w'], eye_w).reshape(W * two_m, W * M)
    W2 = jnp.block([[W2h, jnp.zeros((H * two_m, W * M), f32)],
                    [jnp.zeros((W * two_m, H * M), f32), W2w]])  # ((H+W)*2M, (H+W)*M)
    b2 = jnp.concatenate([jnp.tile(p['b2h'], H),
                          jnp.tile(p['b2w'], W)]).reshape(1, -1)

    # --- final Linears (flatten-order permutation fused into the weight) ----
    # PyTorch flattens (B, M, H, 1) with index m*H+h; our columns are h*M+m.
    WLh = p['wlh'].reshape(O, M, H).transpose(2, 1, 0).reshape(H * M, O)
    WLw = p['wlw'].reshape(O, M, W).transpose(2, 1, 0).reshape(W * M, O)
    W3 = jnp.concatenate([WLh, WLw], axis=0)                     # ((H+W)*M, O)
    b3 = (p['blh'] + p['blw']).reshape(1, O)

    return {'W1': W1.astype(f32), 'b1': b1.astype(f32),
            'W2': W2.astype(f32), 'b2': b2.astype(f32),
            'W3': W3.astype(f32), 'b3': b3.astype(f32)}


# ------------------------- forward wrapper -------------------------

def biconvnet_forward(state, prepped):
    """state: (B, C, H, W) float32 (NCHW, same as the PyTorch module)."""
    B = state.shape[0]
    feat = state.shape[1] * state.shape[2] * state.shape[3]
    xf = state.reshape(B, feat)                 # contiguous -> free reshape
    O = prepped['W3'].shape[1]

    vmem = lambda: pl.BlockSpec(memory_space=pltpu.MemorySpace.VMEM)
    return pl.pallas_call(
        fused_kernel,
        out_shape=jax.ShapeDtypeStruct((B, O), jnp.float32),
        in_specs=[vmem() for _ in range(7)],
        out_specs=vmem(),
    )(xf, prepped['W1'], prepped['b1'], prepped['W2'], prepped['b2'],
      prepped['W3'], prepped['b3'])


# ------------------------- pure-JAX reference (mirrors the torch math) ----

def reference_forward(state, p):
    B, C, H, W = state.shape
    ch = jnp.einsum('bchw,ocw->boh', state, p['w1h']) + p['b1h'][None, :, None]
    ch = jnp.where(ch > 0, ch, 0.01 * ch)
    ch = jnp.einsum('bkh,ok->boh', ch, p['w2h']) + p['b2h'][None, :, None]
    ch = jnp.maximum(ch, 0.0)
    xh = ch.reshape(B, -1) @ p['wlh'].T + p['blh']

    cw = jnp.einsum('bchw,och->bow', state, p['w1w']) + p['b1w'][None, :, None]
    cw = jnp.where(cw > 0, cw, 0.01 * cw)
    cw = jnp.einsum('bkw,ok->bow', cw, p['w2w']) + p['b2w'][None, :, None]
    cw = jnp.maximum(cw, 0.0)
    xw = cw.reshape(B, -1) @ p['wlw'].T + p['blw']
    return xw + xh


# ------------------------- parameter init -------------------------

def init_params(key, mid_dim, inp_dim, out_dim):
    C, H, W = inp_dim
    M = mid_dim
    ks = jax.random.split(key, 12)
    s = 0.1

    def n(k, shape):
        return (s * jax.random.normal(k, shape)).astype(jnp.float32)

    return {
        # cnn_h:  Conv2d(C, 2M, (1, W)), Conv2d(2M, M, (1, 1))
        'w1h': n(ks[0], (2 * M, C, W)),    'b1h': n(ks[1], (2 * M,)),
        'w2h': n(ks[2], (M, 2 * M)),       'b2h': n(ks[3], (M,)),
        # linear_h: Linear(H*M, out_dim)
        'wlh': n(ks[4], (out_dim, M * H)), 'blh': n(ks[5], (out_dim,)),
        # cnn_w:  Conv2d(C, 2M, (H, 1)), Conv2d(2M, M, (1, 1))
        'w1w': n(ks[6], (2 * M, C, H)),    'b1w': n(ks[7], (2 * M,)),
        'w2w': n(ks[8], (M, 2 * M)),       'b2w': n(ks[9], (M,)),
        # linear_w: Linear(W*M, out_dim)
        'wlw': n(ks[10], (out_dim, M * W)), 'blw': n(ks[11], (out_dim,)),
    }


# ------------------------- main -------------------------

if __name__ == "__main__":
    B, C, H, W = 2, 4, 16, 16
    mid_dim, out_dim = 8, 32

    key = jax.random.PRNGKey(0)
    k_x, k_p = jax.random.split(key)
    state = jax.random.normal(k_x, (B, C, H, W), dtype=jnp.float32)
    params = init_params(k_p, mid_dim, (C, H, W), out_dim)

    # one-time parameter prep (hoisted out of the per-step forward)
    prepped = prepare_params(params, (C, H, W))
    prepped = jax.tree_util.tree_map(jax.block_until_ready, prepped)

    fwd = jax.jit(biconvnet_forward)
    out = jax.block_until_ready(fwd(state, prepped))

    ref = reference_forward(state, params)
    assert out.shape == (B, out_dim), out.shape
    assert jnp.allclose(out, ref, atol=1e-4, rtol=1e-4), \
        f"max abs err {jnp.max(jnp.abs(out - ref))}"

    print("KERNEL_OK")
</pallas_src>

<mosaic_0001>
module attributes {stable_mosaic.version = 11 : i64} {
  func.func @fused_kernel(%arg0: memref<2x1024xf32, #tpu.memory_space<vmem>>, %arg1: memref<1024x512xf32, #tpu.memory_space<vmem>>, %arg2: memref<1x512xf32, #tpu.memory_space<vmem>>, %arg3: memref<512x256xf32, #tpu.memory_space<vmem>>, %arg4: memref<1x256xf32, #tpu.memory_space<vmem>>, %arg5: memref<256x32xf32, #tpu.memory_space<vmem>>, %arg6: memref<1x32xf32, #tpu.memory_space<vmem>>, %arg7: memref<2x32xf32, #tpu.memory_space<vmem>>) attributes {dimension_semantics = [], scalar_prefetch = 0 : i64, scratch_operands = 0 : i64, tpu.core_type = #tpu.core_type<tc>} {
    %c0 = arith.constant 0 : index
    %c0_0 = arith.constant 0 : index
    %0 = vector.load %arg0[%c0, %c0_0] : memref<2x1024xf32, #tpu.memory_space<vmem>>, vector<2x1024xf32>
    %c0_1 = arith.constant 0 : index
    %c0_2 = arith.constant 0 : index
    %1 = vector.load %arg1[%c0_1, %c0_2] : memref<1024x512xf32, #tpu.memory_space<vmem>>, vector<1024x512xf32>
    %cst = arith.constant dense<0.000000e+00> : vector<2x512xf32>
    %2 = tpu.matmul %0, %1, %cst {dimension_numbers = #tpu.dot_dimension_numbers<[1], [0], [0], [1], [0, 0, 1, 1], [], []>} : vector<2x1024xf32>, vector<1024x512xf32>, vector<2x512xf32> -> vector<2x512xf32>
    %c0_3 = arith.constant 0 : index
    %c0_4 = arith.constant 0 : index
    %3 = vector.load %arg2[%c0_3, %c0_4] : memref<1x512xf32, #tpu.memory_space<vmem>>, vector<1x512xf32>
    %4 = vector.broadcast %3 : vector<1x512xf32> to vector<2x512xf32>
    %5 = arith.addf %2, %4 : vector<2x512xf32>
    %cst_5 = arith.constant 0.000000e+00 : f32
    %6 = vector.broadcast %cst_5 : f32 to vector<2x512xf32>
    %7 = arith.cmpf ogt, %5, %6 : vector<2x512xf32>
    %cst_6 = arith.constant 0.00999999977 : f32
    %8 = vector.broadcast %cst_6 : f32 to vector<2x512xf32>
    %9 = arith.mulf %8, %5 : vector<2x512xf32>
    %10 = arith.select %7, %5, %9 : vector<2x512xi1>, vector<2x512xf32>
    %c0_7 = arith.constant 0 : index
    %c0_8 = arith.constant 0 : index
    %11 = vector.load %arg3[%c0_7, %c0_8] : memref<512x256xf32, #tpu.memory_space<vmem>>, vector<512x256xf32>
    %cst_9 = arith.constant dense<0.000000e+00> : vector<2x256xf32>
    %12 = tpu.matmul %10, %11, %cst_9 {dimension_numbers = #tpu.dot_dimension_numbers<[1], [0], [0], [1], [0, 0, 1, 1], [], []>} : vector<2x512xf32>, vector<512x256xf32>, vector<2x256xf32> -> vector<2x256xf32>
    %c0_10 = arith.constant 0 : index
    %c0_11 = arith.constant 0 : index
    %13 = vector.load %arg4[%c0_10, %c0_11] : memref<1x256xf32, #tpu.memory_space<vmem>>, vector<1x256xf32>
    %14 = vector.broadcast %13 : vector<1x256xf32> to vector<2x256xf32>
    %15 = arith.addf %12, %14 : vector<2x256xf32>
    %cst_12 = arith.constant 0.000000e+00 : f32
    %16 = vector.broadcast %cst_12 : f32 to vector<2x256xf32>
    %17 = arith.maximumf %15, %16 : vector<2x256xf32>
    %c0_13 = arith.constant 0 : index
    %c0_14 = arith.constant 0 : index
    %18 = vector.load %arg5[%c0_13, %c0_14] : memref<256x32xf32, #tpu.memory_space<vmem>>, vector<256x32xf32>
    %cst_15 = arith.constant dense<0.000000e+00> : vector<2x32xf32>
    %19 = tpu.matmul %17, %18, %cst_15 {dimension_numbers = #tpu.dot_dimension_numbers<[1], [0], [0], [1], [0, 0, 1, 1], [], []>} : vector<2x256xf32>, vector<256x32xf32>, vector<2x32xf32> -> vector<2x32xf32>
    %c0_16 = arith.constant 0 : index
    %c0_17 = arith.constant 0 : index
    %20 = vector.load %arg6[%c0_16, %c0_17] : memref<1x32xf32, #tpu.memory_space<vmem>>, vector<1x32xf32>
    %21 = vector.broadcast %20 : vector<1x32xf32> to vector<2x32xf32>
    %22 = arith.addf %19, %21 : vector<2x32xf32>
    %c0_18 = arith.constant 0 : index
    %c0_19 = arith.constant 0 : index
    %23 = vector.load %arg7[%c0_18, %c0_19] : memref<2x32xf32, #tpu.memory_space<vmem>>, vector<2x32xf32>
    tpu.vector_store %arg7[%c0_18, %c0_19], %22 {strides = array<i32>} : memref<2x32xf32, #tpu.memory_space<vmem>>, vector<2x32xf32>,
    return
  }
}

</mosaic_0001>

<bundles_post_ra>
// kernel: biconvnet_forward.1
= control target key start
LH: loop header
LB: loop body
LE: loop exit
PB: predicated region body
PF: predicated region fallthrough
CT: control target
= control target key end

     0   :  { %12 = vsyncpa [#allocation3], 0  ;;  %s2076_s0 = inlined_call_operand.vmem [shape: f32[2,1024], index: 0, kind: input, shape index: {}]   ;;  %s2077_s1 = inlined_call_operand.hbm [shape: f32[1024,512], index: 1, kind: input, shape index: {}]   ;;  %s2078_s2 = inlined_call_operand.hbm [shape: f32[1,512], index: 2, kind: input, shape index: {}]   ;;  %s2079_s3 = inlined_call_operand.hbm [shape: f32[512,256], index: 3, kind: input, shape index: {}]   ;;  %s2080_s4 = inlined_call_operand.hbm [shape: f32[1,256], index: 4, kind: input, shape index: {}]   ;;  %s2081_s5 = inlined_call_operand.vmem [shape: f32[256,32], index: 5, kind: input, shape index: {}]   ;;  %s2082_s6 = inlined_call_operand.hbm [shape: f32[1,32], index: 6, kind: input, shape index: {}]   ;;  %s2083_s7 = inlined_call_operand.hbm [shape: f32[2,32], index: 7, kind: output, shape index: {}]  }
   0x1   :  { %13 = vsyncpa [#allocation6], 0 }
   0x2   :  { %14 = vsyncpa [#allocation9], 0 }
   0x3   :  { %15 = vsyncpa [#allocation4], 0  ;;  %s1838_s24 = smov [#allocation5]   ;;  %s1839_s26 = smov [#allocation8]  }
   0x4   :  { %s36_s25 = sshll.u32 %s1838_s24, 4  ;;  %s58_s27 = sshll.u32 %s1839_s26, 4  ;;  %s37_s25 = int_to_ptr.vmem [resolvable:$true] %s36_s25  ;;  %s59_s27 = int_to_ptr.vmem [resolvable:$true] %s58_s27 }
   0x5   :  { %s1718_s28 = scalar_lea.vmem %s37_s25, 64  ;;  %p1723_p1 = scmp.lt.s32.totalorder %s37_s25, %s37_s25 }
   0x6   :  { %p1719_p0 = scmp.ne.s32.totalorder %s37_s25, %s1718_s28  ;;  %p1724_p2 = scmp.lt.s32.totalorder %s1718_s28, %s1718_s28 }
   0x8   :  { %p1725_p3 = por %p1724_p2, %p1723_p1 }
   0xa   :  { %p1726_p4 = pnand %p1725_p3, %p1719_p0 }
   0xc   :  { %1729 = shalt.err (!%p1726_p4)
}
   0xd   :  { %39 = dma.hbm_to_vmem [thread:$0]  %s2078_s2, 64, %s37_s25, [#allocation6]  }
   0xe   :  { %s1738_s8 = scalar_lea.vmem %s59_s27, 32  ;;  %p1743_p6 = scmp.lt.s32.totalorder %s59_s27, %s59_s27 }
   0xf   :  { %p1739_p5 = scmp.ne.s32.totalorder %s59_s27, %s1738_s8  ;;  %p1744_p7 = scmp.lt.s32.totalorder %s1738_s8, %s1738_s8 }
  0x11   :  { %p1745_p8 = por %p1744_p7, %p1743_p6 }
  0x13   :  { %p1746_p9 = pnand %p1745_p8, %p1739_p5 }
  0x15   :  { %1749 = shalt.err (!%p1746_p9)
}
  0x16   :  { %61 = dma.hbm_to_vmem [thread:$0]  %s2080_s4, 32, %s59_s27, [#allocation9]  }
  0x17   :  { %s1840_s11 = smov [#allocation2]  }
  0x18   :  { %s23_s12 = sshll.u32 %s1840_s11, 4  ;;  %s24_s12 = int_to_ptr.vmem [resolvable:$true] %s23_s12 }
  0x19   :  { %s1758_s13 = scalar_lea.vmem %s24_s12, 65536  ;;  %p1763_p11 = scmp.lt.s32.totalorder %s24_s12, %s24_s12 }
  0x1a   :  { %p1759_p10 = scmp.ne.s32.totalorder %s24_s12, %s1758_s13  ;;  %p1764_p12 = scmp.lt.s32.totalorder %s1758_s13, %s1758_s13 }
  0x1c   :  { %p1765_p13 = por %p1764_p12, %p1763_p11 }
  0x1e   :  { %p1766_p0 = pnand %p1765_p13, %p1759_p10 }
  0x20   :  { %1769 = shalt.err (!%p1766_p0)
}
  0x21   :  { %s1841_s2 = smov 512   ;;  %s1842_s14 = smov 32  }
  0x22   :  { %29 = dma.hbm_to_vmem [thread:$0]  %s2077_s1, 65536, %s24_s12, [#allocation3], %s1841_s2, %s1841_s2, %s1842_s14  }
  0x23   :  { %s1843_s17 = smov [#allocation7]  }
  0x24   :  { %s45_s18 = sshll.u32 %s1843_s17, 4  ;;  %s46_s18 = int_to_ptr.vmem [resolvable:$true] %s45_s18 }
  0x25   :  { %s1778_s4 = scalar_lea.vmem %s46_s18, 16384  ;;  %p1783_p2 = scmp.lt.s32.totalorder %s46_s18, %s46_s18 }
  0x26   :  { %p1779_p1 = scmp.ne.s32.totalorder %s46_s18, %s1778_s4  ;;  %p1784_p3 = scmp.lt.s32.totalorder %s1778_s4, %s1778_s4 }
  0x28   :  { %p1785_p4 = por %p1784_p3, %p1783_p2 }
  0x2a   :  { %p1786_p5 = pnand %p1785_p4, %p1779_p1 }
  0x2c   :  { %1789 = shalt.err (!%p1786_p5)
}
  0x2d   :  { %s1844_s19 = smov 256   ;;  %s1845_s20 = smov 16  }
  0x2e   :  { %51 = dma.hbm_to_vmem [thread:$0]  %s2079_s3, 16384, %s46_s18, [#allocation6], %s1844_s19, %s1844_s19, %s1845_s20  }
  0x2f   :  { %s1846_s23 = smov [#allocation10]  }
  0x30   :  { %s70_s24 = sshll.u32 %s1846_s23, 4  ;;  %s71_s24 = int_to_ptr.vmem [resolvable:$true] %s70_s24 }
  0x31   :  { %s1798_s1 = scalar_lea.vmem %s71_s24, 16  ;;  %s1802_s25 = scalar_lea.vmem %s71_s24, 32 }
  0x32   :  { %p1799_p6 = scmp.ne.s32.totalorder %s71_s24, %s1798_s1  ;;  %p1803_p7 = scmp.lt.s32.totalorder %s71_s24, %s71_s24 }
  0x33   :  { %p1804_p8 = scmp.lt.s32.totalorder %s1802_s25, %s1798_s1 }
  0x35   :  { %p1805_p9 = por %p1804_p8, %p1803_p7 }
  0x37   :  { %p1806_p10 = pnand %p1805_p9, %p1799_p6 }
  0x39   :  { %1809 = shalt.err (!%p1806_p10)
}
  0x3a   :  { %73 = dma.hbm_to_vmem [thread:$0]  %s2082_s6, 16, %s71_s24, [#allocation9]  }
  0x3b   :  { %1830 = dma.done.wait [#allocation3], 65536  }
  0x3c   :  { %1831 = vsyncadd [#allocation3], 4294901760 }
  0x3d   :  { %1832 = dma.done.wait [#allocation6], 16448  }
  0x3e   :  { %1833 = vsyncadd [#allocation6], 4294950848 }
  0x3f   :  { %1834 = dma.done.wait [#allocation9], 48  }
  0x40   :  { %1835 = vsyncadd [#allocation9], 4294967248  ;;  %v152_v0 = vld [vmem:[#allocation2 + $0x1e8] sm:$0xff]  ;;  %v151_v2 = vld [vmem:[#allocation2 + $0x1e0] sm:$0xff]  ;;  %vm1642_vm4 = vcmask 254976  }
  0x41   :  { %v280_v1 = vld [vmem:[#allocation2 + $0x5e8] sm:$0xff]  ;;  %669 = vmatprep.subr.mxu0 %v152_v0  ;;  %v279_v3 = vld [vmem:[#allocation2 + $0x5e0] sm:$0xff] }
  0x42   :  { %740 = vmatprep.subr.mxu1 %v280_v1  ;;  %v148_v4 = vld [vmem:[#allocation2 + $0x1c8] sm:$0xff]  ;;  %670 = vmatpush1.msra.mxu0 %v151_v2  ;;  %v147_v6 = vld [vmem:[#allocation2 + $0x1c0] sm:$0xff] }
  0x43   :  { %v276_v5 = vld [vmem:[#allocation2 + $0x5c8] sm:$0xff]  ;;  %741 = vmatpush1.msra.mxu1 %v279_v3  ;;  %v275_v7 = vld [vmem:[#allocation2 + $0x5c0] sm:$0xff]  ;;  %671 = vmatprep.subr.mxu0 %v148_v4 }
  0x44   :  { %v144_v8 = vld [vmem:[#allocation2 + $0x1a8] sm:$0xff]  ;;  %742 = vmatprep.subr.mxu1 %v276_v5  ;;  %v143_v10 = vld [vmem:[#allocation2 + $0x1a0] sm:$0xff]  ;;  %672 = vmatpush1.msra.mxu0 %v147_v6 }
  0x45   :  { %v272_v9 = vld [vmem:[#allocation2 + $0x5a8] sm:$0xff]  ;;  %v271_v11 = vld [vmem:[#allocation2 + $0x5a0] sm:$0xff]  ;;  %743 = vmatpush1.msra.mxu1 %v275_v7  ;;  %673 = vmatprep.subr.mxu0 %v144_v8 }
  0x46   :  { %v140_v12 = vld [vmem:[#allocation2 + $0x188] sm:$0xff]  ;;  %744 = vmatprep.subr.mxu1 %v272_v9  ;;  %v139_v14 = vld [vmem:[#allocation2 + $0x180] sm:$0xff]  ;;  %674 = vmatpush1.msra.mxu0 %v143_v10 }
  0x47   :  { %v268_v13 = vld [vmem:[#allocation2 + $0x588] sm:$0xff]  ;;  %v267_v15 = vld [vmem:[#allocation2 + $0x580] sm:$0xff]  ;;  %745 = vmatpush1.msra.mxu1 %v271_v11  ;;  %675 = vmatprep.subr.mxu0 %v140_v12 }
  0x48   :  { %v136_v16 = vld [vmem:[#allocation2 + $0x168] sm:$0xff]  ;;  %746 = vmatprep.subr.mxu1 %v268_v13  ;;  %v135_v18 = vld [vmem:[#allocation2 + $0x160] sm:$0xff]  ;;  %676 = vmatpush1.msra.mxu0 %v139_v14 }
  0x49   :  { %v264_v17 = vld [vmem:[#allocation2 + $0x568] sm:$0xff]  ;;  %v263_v19 = vld [vmem:[#allocation2 + $0x560] sm:$0xff]  ;;  %747 = vmatpush1.msra.mxu1 %v267_v15  ;;  %677 = vmatprep.subr.mxu0 %v136_v16 }
  0x4a   :  { %v132_v20 = vld [vmem:[#allocation2 + $0x148] sm:$0xff]  ;;  %748 = vmatprep.subr.mxu1 %v264_v17  ;;  %v131_v22 = vld [vmem:[#allocation2 + $0x140] sm:$0xff]  ;;  %678 = vmatpush1.msra.mxu0 %v135_v18 }
  0x4b   :  { %v260_v21 = vld [vmem:[#allocation2 + $0x548] sm:$0xff]  ;;  %v259_v23 = vld [vmem:[#allocation2 + $0x540] sm:$0xff]  ;;  %749 = vmatpush1.msra.mxu1 %v263_v19  ;;  %679 = vmatprep.subr.mxu0 %v132_v20 }
  0x4c   :  { %v128_v24 = vld [vmem:[#allocation2 + $0x128] sm:$0xff]  ;;  %750 = vmatprep.subr.mxu1 %v260_v21  ;;  %v127_v26 = vld [vmem:[#allocation2 + $0x120] sm:$0xff]  ;;  %680 = vmatpush1.msra.mxu0 %v131_v22 }
  0x4d   :  { %v256_v25 = vld [vmem:[#allocation2 + $0x528] sm:$0xff]  ;;  %v255_v27 = vld [vmem:[#allocation2 + $0x520] sm:$0xff]  ;;  %751 = vmatpush1.msra.mxu1 %v259_v23  ;;  %681 = vmatprep.subr.mxu0 %v128_v24 }
  0x4e   :  { %v124_v28 = vld [vmem:[#allocation2 + $0x108] sm:$0xff]  ;;  %752 = vmatprep.subr.mxu1 %v256_v25  ;;  %v123_v30 = vld [vmem:[#allocation2 + $0x100] sm:$0xff]  ;;  %682 = vmatpush1.msra.mxu0 %v127_v26 }
  0x4f   :  { %v252_v29 = vld [vmem:[#allocation2 + $0x508] sm:$0xff]  ;;  %v251_v31 = vld [vmem:[#allocation2 + $0x500] sm:$0xff]  ;;  %753 = vmatpush1.msra.mxu1 %v255_v27  ;;  %683 = vmatprep.subr.mxu0 %v124_v28 }
  0x50   :  { %v120_v32 = vld [vmem:[#allocation2 + $0xe8] sm:$0xff]  ;;  %754 = vmatprep.subr.mxu1 %v252_v29  ;;  %v119_v34 = vld [vmem:[#allocation2 + $0xe0] sm:$0xff]  ;;  %684 = vmatpush1.msra.mxu0 %v123_v30  ;;  %v605_v30 = vlaneseq }
  0x51   :  { %v248_v33 = vld [vmem:[#allocation2 + $0x4e8] sm:$0xff]  ;;  %v247_v35 = vld [vmem:[#allocation2 + $0x4e0] sm:$0xff]  ;;  %755 = vmatpush1.msra.mxu1 %v251_v31  ;;  %685 = vmatprep.subr.mxu0 %v120_v32  ;;  %v1847_v31 = vmov 1983009808  }
  0x52   :  { %v116_v36 = vld [vmem:[#allocation2 + $0xc8] sm:$0xff]  ;;  %756 = vmatprep.subr.mxu1 %v248_v33  ;;  %v115_v38 = vld [vmem:[#allocation2 + $0xc0] sm:$0xff]  ;;  %686 = vmatpush1.msra.mxu0 %v119_v34  ;;  %v629_v32 = vunpack.c.l.s4 %v1847_v31 }
  0x53   :  { %v244_v37 = vld [vmem:[#allocation2 + $0x4c8] sm:$0xff]  ;;  %v243_v39 = vld [vmem:[#allocation2 + $0x4c0] sm:$0xff]  ;;  %757 = vmatpush1.msra.mxu1 %v247_v35  ;;  %687 = vmatprep.subr.mxu0 %v116_v36 }
  0x54   :  { %v112_v40 = vld [vmem:[#allocation2 + $0xa8] sm:$0xff]  ;;  %758 = vmatprep.subr.mxu1 %v244_v37  ;;  %v111_v42 = vld [vmem:[#allocation2 + $0xa0] sm:$0xff]  ;;  %688 = vmatpush1.msra.mxu0 %v115_v38 }
  0x55   :  { %v240_v41 = vld [vmem:[#allocation2 + $0x4a8] sm:$0xff]  ;;  %v239_v43 = vld [vmem:[#allocation2 + $0x4a0] sm:$0xff]  ;;  %759 = vmatpush1.msra.mxu1 %v243_v39  ;;  %689 = vmatprep.subr.mxu0 %v112_v40 }
  0x56   :  { %v108_v44 = vld [vmem:[#allocation2 + $0x88] sm:$0xff]  ;;  %760 = vmatprep.subr.mxu1 %v240_v41  ;;  %v107_v46 = vld [vmem:[#allocation2 + $0x80] sm:$0xff]  ;;  %690 = vmatpush1.msra.mxu0 %v111_v42  ;;  %v1904_v41 = vshrl.u32 %v605_v30, 7  ;;  %v630_v42 = vunpack.c.0.s8 %v629_v32 }
  0x57   :  { %v236_v45 = vld [vmem:[#allocation2 + $0x488] sm:$0xff]  ;;  %v235_v47 = vld [vmem:[#allocation2 + $0x480] sm:$0xff]  ;;  %761 = vmatpush1.msra.mxu1 %v239_v43  ;;  %691 = vmatprep.subr.mxu0 %v108_v44 }
  0x58   :  { %v104_v48 = vld [vmem:[#allocation2 + $0x68] sm:$0xff]  ;;  %762 = vmatprep.subr.mxu1 %v236_v45  ;;  %v103_v50 = vld [vmem:[#allocation2 + $0x60] sm:$0xff]  ;;  %692 = vmatpush1.msra.mxu0 %v107_v46 }
  0x59   :  { %v232_v49 = vld [vmem:[#allocation2 + $0x468] sm:$0xff]  ;;  %v231_v51 = vld [vmem:[#allocation2 + $0x460] sm:$0xff]  ;;  %763 = vmatpush1.msra.mxu1 %v235_v47  ;;  %693 = vmatprep.subr.mxu0 %v104_v48 }
  0x5a   :  { %v100_v52 = vld [vmem:[#allocation2 + $0x48] sm:$0xff]  ;;  %764 = vmatprep.subr.mxu1 %v232_v49  ;;  %v99_v54 = vld [vmem:[#allocation2 + $0x40] sm:$0xff]  ;;  %694 = vmatpush1.msra.mxu0 %v103_v50 }
  0x5b   :  { %v228_v53 = vld [vmem:[#allocation2 + $0x448] sm:$0xff]  ;;  %v227_v55 = vld [vmem:[#allocation2 + $0x440] sm:$0xff]  ;;  %765 = vmatpush1.msra.mxu1 %v231_v51  ;;  %695 = vmatprep.subr.mxu0 %v100_v52  ;;  %v1910_v52 = vsub.s32 %v630_v42, %v1904_v41 }
  0x5c   :  { %v96_v56 = vld [vmem:[#allocation2 + $0x28] sm:$0xff]  ;;  %766 = vmatprep.subr.mxu1 %v228_v53  ;;  %v95_v58 = vld [vmem:[#allocation2 + $0x20] sm:$0xff]  ;;  %696 = vmatpush1.msra.mxu0 %v99_v54 }
  0x5d   :  { %v224_v57 = vld [vmem:[#allocation2 + $0x428] sm:$0xff]  ;;  %v223_v59 = vld [vmem:[#allocation2 + $0x420] sm:$0xff]  ;;  %767 = vmatpush1.msra.mxu1 %v227_v55  ;;  %697 = vmatprep.subr.mxu0 %v96_v56 }
  0x5e   :  { %v92_v60 = vld [vmem:[#allocation2 + $0x8] sm:$0xff]  ;;  %768 = vmatprep.subr.mxu1 %v224_v57  ;;  %v91_v62 = vld [vmem:[#allocation2] sm:$0xff]  ;;  %698 = vmatpush1.msra.mxu0 %v95_v58 }
  0x5f   :  { %v220_v61 = vld [vmem:[#allocation2 + $0x408] sm:$0xff]  ;;  %v219_v63 = vld [vmem:[#allocation2 + $0x400] sm:$0xff]  ;;  %769 = vmatpush1.msra.mxu1 %v223_v59  ;;  %699 = vmatprep.subr.mxu0 %v92_v60 }
  0x60   :  { %v216_v0 = vld [vmem:[#allocation2 + $0x3e8] sm:$0xff]  ;;  %770 = vmatprep.subr.mxu1 %v220_v61  ;;  %v215_v2 = vld [vmem:[#allocation2 + $0x3e0] sm:$0xff]  ;;  %700 = vmatpush1.msra.mxu0 %v91_v62 }
  0x61   :  { %v344_v1 = vld [vmem:[#allocation2 + $0x7e8] sm:$0xff]  ;;  %v343_v3 = vld [vmem:[#allocation2 + $0x7e0] sm:$0xff]  ;;  %771 = vmatpush1.msra.mxu1 %v219_v63  ;;  %701 = vmatprep.subr.mxu0 %v216_v0 }
  0x62   :  { %v212_v4 = vld [vmem:[#allocation2 + $0x3c8] sm:$0xff]  ;;  %772 = vmatprep.subr.mxu1 %v344_v1  ;;  %v211_v6 = vld [vmem:[#allocation2 + $0x3c0] sm:$0xff]  ;;  %702 = vmatpush2.msra.mxu0 %v215_v2 }
  0x63   :  { %v340_v5 = vld [vmem:[#allocation2 + $0x7c8] sm:$0xff]  ;;  %v339_v7 = vld [vmem:[#allocation2 + $0x7c0] sm:$0xff]  ;;  %773 = vmatpush2.msra.mxu1 %v343_v3  ;;  %703 = vmatprep.subr.mxu0 %v212_v4 }
  0x64   :  { %v208_v8 = vld [vmem:[#allocation2 + $0x3a8] sm:$0xff]  ;;  %774 = vmatprep.subr.mxu1 %v340_v5  ;;  %v207_v10 = vld [vmem:[#allocation2 + $0x3a0] sm:$0xff]  ;;  %704 = vmatpush2.msra.mxu0 %v211_v6 }
  0x65   :  { %v336_v9 = vld [vmem:[#allocation2 + $0x7a8] sm:$0xff]  ;;  %v335_v11 = vld [vmem:[#allocation2 + $0x7a0] sm:$0xff]  ;;  %775 = vmatpush2.msra.mxu1 %v339_v7  ;;  %705 = vmatprep.subr.mxu0 %v208_v8 }
  0x66   :  { %v204_v12 = vld [vmem:[#allocation2 + $0x388] sm:$0xff]  ;;  %776 = vmatprep.subr.mxu1 %v336_v9  ;;  %v203_v14 = vld [vmem:[#allocation2 + $0x380] sm:$0xff]  ;;  %706 = vmatpush2.msra.mxu0 %v207_v10 }
  0x67   :  { %v332_v13 = vld [vmem:[#allocation2 + $0x788] sm:$0xff]  ;;  %v331_v15 = vld [vmem:[#allocation2 + $0x780] sm:$0xff]  ;;  %777 = vmatpush2.msra.mxu1 %v335_v11  ;;  %707 = vmatprep.subr.mxu0 %v204_v12 }
  0x68   :  { %v200_v16 = vld [vmem:[#allocation2 + $0x368] sm:$0xff]  ;;  %778 = vmatprep.subr.mxu1 %v332_v13  ;;  %v199_v18 = vld [vmem:[#allocation2 + $0x360] sm:$0xff]  ;;  %708 = vmatpush2.msra.mxu0 %v203_v14 }
  0x69   :  { %v328_v17 = vld [vmem:[#allocation2 + $0x768] sm:$0xff]  ;;  %v327_v19 = vld [vmem:[#allocation2 + $0x760] sm:$0xff]  ;;  %779 = vmatpush2.msra.mxu1 %v331_v15  ;;  %709 = vmatprep.subr.mxu0 %v200_v16 }
  0x6a   :  { %v196_v20 = vld [vmem:[#allocation2 + $0x348] sm:$0xff]  ;;  %780 = vmatprep.subr.mxu1 %v328_v17  ;;  %v195_v22 = vld [vmem:[#allocation2 + $0x340] sm:$0xff]  ;;  %710 = vmatpush2.msra.mxu0 %v199_v18 }
  0x6b   :  { %v324_v21 = vld [vmem:[#allocation2 + $0x748] sm:$0xff]  ;;  %v323_v23 = vld [vmem:[#allocation2 + $0x740] sm:$0xff]  ;;  %781 = vmatpush2.msra.mxu1 %v327_v19  ;;  %711 = vmatprep.subr.mxu0 %v196_v20 }
  0x6c   :  { %v192_v24 = vld [vmem:[#allocation2 + $0x328] sm:$0xff]  ;;  %782 = vmatprep.subr.mxu1 %v324_v21  ;;  %v191_v26 = vld [vmem:[#allocation2 + $0x320] sm:$0xff]  ;;  %712 = vmatpush2.msra.mxu0 %v195_v22 }
  0x6d   :  { %v320_v25 = vld [vmem:[#allocation2 + $0x728] sm:$0xff]  ;;  %v319_v27 = vld [vmem:[#allocation2 + $0x720] sm:$0xff]  ;;  %783 = vmatpush2.msra.mxu1 %v323_v23  ;;  %713 = vmatprep.subr.mxu0 %v192_v24 }
  0x6e   :  { %v188_v28 = vld [vmem:[#allocation2 + $0x308] sm:$0xff]  ;;  %784 = vmatprep.subr.mxu1 %v320_v25  ;;  %v187_v33 = vld [vmem:[#allocation2 + $0x300] sm:$0xff]  ;;  %714 = vmatpush2.msra.mxu0 %v191_v26 }
  0x6f   :  { %v316_v29 = vld [vmem:[#allocation2 + $0x708] sm:$0xff]  ;;  %v315_v34 = vld [vmem:[#allocation2 + $0x700] sm:$0xff]  ;;  %785 = vmatpush2.msra.mxu1 %v319_v27  ;;  %715 = vmatprep.subr.mxu0 %v188_v28 }
  0x70   :  { %v184_v35 = vld [vmem:[#allocation2 + $0x2e8] sm:$0xff]  ;;  %786 = vmatprep.subr.mxu1 %v316_v29  ;;  %v183_v37 = vld [vmem:[#allocation2 + $0x2e0] sm:$0xff]  ;;  %716 = vmatpush2.msra.mxu0 %v187_v33 }
  0x71   :  { %v312_v36 = vld [vmem:[#allocation2 + $0x6e8] sm:$0xff]  ;;  %v311_v38 = vld [vmem:[#allocation2 + $0x6e0] sm:$0xff]  ;;  %787 = vmatpush2.msra.mxu1 %v315_v34  ;;  %717 = vmatprep.subr.mxu0 %v184_v35 }
  0x72   :  { %v180_v39 = vld [vmem:[#allocation2 + $0x2c8] sm:$0xff]  ;;  %788 = vmatprep.subr.mxu1 %v312_v36  ;;  %v179_v43 = vld [vmem:[#allocation2 + $0x2c0] sm:$0xff]  ;;  %718 = vmatpush2.msra.mxu0 %v183_v37 }
  0x73   :  { %v308_v40 = vld [vmem:[#allocation2 + $0x6c8] sm:$0xff]  ;;  %v307_v44 = vld [vmem:[#allocation2 + $0x6c0] sm:$0xff]  ;;  %789 = vmatpush2.msra.mxu1 %v311_v38  ;;  %719 = vmatprep.subr.mxu0 %v180_v39 }
  0x74   :  { %v176_v45 = vld [vmem:[#allocation2 + $0x2a8] sm:$0xff]  ;;  %790 = vmatprep.subr.mxu1 %v308_v40  ;;  %v175_v47 = vld [vmem:[#allocation2 + $0x2a0] sm:$0xff]  ;;  %720 = vmatpush2.msra.mxu0 %v179_v43 }
  0x75   :  { %v304_v46 = vld [vmem:[#allocation2 + $0x6a8] sm:$0xff]  ;;  %v303_v48 = vld [vmem:[#allocation2 + $0x6a0] sm:$0xff]  ;;  %791 = vmatpush2.msra.mxu1 %v307_v44  ;;  %721 = vmatprep.subr.mxu0 %v176_v45 }
  0x76   :  { %v89_v49 = vld [vmem:[%s2076_s0] sm:$0xff]  ;;  %v172_v50 = vld [vmem:[#allocation2 + $0x288] sm:$0xff]  ;;  %792 = vmatprep.subr.mxu1 %v304_v46  ;;  %722 = vmatpush2.msra.mxu0 %v175_v47 }
  0x77   :  { %v300_v51 = vld [vmem:[#allocation2 + $0x688] sm:$0xff]  ;;  %v171_v53 = vld [vmem:[#allocation2 + $0x280] sm:$0xff]  ;;  %793 = vmatpush2.msra.mxu1 %v303_v48  ;;  %v627_v57 = vcombine.high %v89_v49, %v89_v49  ;;  %723 = vmatprep.subr.mxu0 %v172_v50  ;;  %v1913_v62 = vrot.slane %v89_v49, %v1910_v52 }
  0x78   :  { %v299_v54 = vld [vmem:[#allocation2 + $0x680] sm:$0xff]  ;;  %v168_v55 = vld [vmem:[#allocation2 + $0x268] sm:$0xff]  ;;  %794 = vmatprep.subr.mxu1 %v300_v51  ;;  %724 = vmatpush2.msra.mxu0 %v171_v53 }
  0x79   :  { %v296_v56 = vld [vmem:[#allocation2 + $0x668] sm:$0xff]  ;;  %v167_v58 = vld [vmem:[#allocation2 + $0x260] sm:$0xff]  ;;  %795 = vmatpush2.msra.mxu1 %v299_v54  ;;  %725 = vmatprep.subr.mxu0 %v168_v55  ;;  %v1916_v3 = vrot.slane %v627_v57, %v1910_v52  ;;  %v1920_v8 = vcombine.high %v1913_v62, %v1913_v62 }
  0x7a   :  { %v295_v59 = vld [vmem:[#allocation2 + $0x660] sm:$0xff]  ;;  %v164_v60 = vld [vmem:[#allocation2 + $0x248] sm:$0xff]  ;;  %796 = vmatprep.subr.mxu1 %v296_v56  ;;  %726 = vmatpush2.msra.mxu0 %v167_v58 }
  0x7b   :  { %v292_v61 = vld [vmem:[#allocation2 + $0x648] sm:$0xff]  ;;  %v163_v63 = vld [vmem:[#allocation2 + $0x240] sm:$0xff]  ;;  %797 = vmatpush2.msra.mxu1 %v295_v59  ;;  %727 = vmatprep.subr.mxu0 %v164_v60  ;;  %v1924_v11 = vcombine.high %v1916_v3, %v1916_v3 }
  0x7c   :  { %v291_v0 = vld [vmem:[#allocation2 + $0x640] sm:$0xff]  ;;  %v160_v1 = vld [vmem:[#allocation2 + $0x228] sm:$0xff]  ;;  %798 = vmatprep.subr.mxu1 %v292_v61  ;;  %728 = vmatpush2.msra.mxu0 %v163_v63 }
  0x7d   :  { %v288_v2 = vld [vmem:[#allocation2 + $0x628] sm:$0xff]  ;;  %v159_v4 = vld [vmem:[#allocation2 + $0x220] sm:$0xff]  ;;  %799 = vmatpush2.msra.mxu1 %v291_v0  ;;  %729 = vmatprep.subr.mxu0 %v160_v1 }
  0x7e   :  { %v287_v5 = vld [vmem:[#allocation2 + $0x620] sm:$0xff]  ;;  %v156_v6 = vld [vmem:[#allocation2 + $0x208] sm:$0xff]  ;;  %800 = vmatprep.subr.mxu1 %v288_v2  ;;  %730 = vmatpush2.msra.mxu0 %v159_v4 }
  0x7f   :  { %v284_v7 = vld [vmem:[#allocation2 + $0x608] sm:$0xff]  ;;  %v155_v9 = vld [vmem:[#allocation2 + $0x200] sm:$0xff]  ;;  %801 = vmatpush2.msra.mxu1 %v287_v5  ;;  %731 = vmatprep.subr.mxu0 %v156_v6 }
  0x80   :  { %v283_v10 = vld [vmem:[#allocation2 + $0x600] sm:$0xff]  ;;  %802 = vmatprep.subr.mxu1 %v284_v7  ;;  %v408_v12 = vld [vmem:[#allocation2 + $0x9e8] sm:$0xff]  ;;  %732 = vmatpush2.msra.mxu0 %v155_v9 }
  0x81   :  { %733 = vmatprep.mubr.f32.mxu0 %v1920_v8  ;;  %v536_v13 = vld [vmem:[#allocation2 + $0xde8] sm:$0xff]  ;;  %803 = vmatpush2.msra.mxu1 %v283_v10  ;;  %v407_v14 = vld [vmem:[#allocation2 + $0x9e0] sm:$0xff] }
  0x82   :  { %734 = vmatmul.mubr.f32.vlgmr.msra.gmra.mxu0 %v1913_v62  ;;  %v535_v15 = vld [vmem:[#allocation2 + $0xde0] sm:$0xff]  ;;  %804 = vmatprep.mubr.f32.mxu1 %v1924_v11  ;;  %v404_v16 = vld [vmem:[#allocation2 + $0x9c8] sm:$0xff] }
  0x83   :  { %811 = vmatprep.subr.mxu0 %v408_v12  ;;  %v532_v17 = vld [vmem:[#allocation2 + $0xdc8] sm:$0xff]  ;;  %882 = vmatprep.subr.mxu1 %v536_v13  ;;  %v403_v18 = vld [vmem:[#allocation2 + $0x9c0] sm:$0xff] }
  0x84   :  { %805 = vmatmul.mubr.f32.vlgmr.msra.gmra.mxu1 %v1916_v3  ;;  %v531_v19 = vld [vmem:[#allocation2 + $0xdc0] sm:$0xff]  ;;  %812 = vmatpush1.msra.mxu0 %v407_v14  ;;  %v400_v20 = vld [vmem:[#allocation2 + $0x9a8] sm:$0xff] }
  0x85   :  { %883 = vmatpush1.msra.mxu1 %v535_v15  ;;  %v528_v21 = vld [vmem:[#allocation2 + $0xda8] sm:$0xff]  ;;  %813 = vmatprep.subr.mxu0 %v404_v16  ;;  %v399_v22 = vld [vmem:[#allocation2 + $0x9a0] sm:$0xff] }
  0x86   :  { %884 = vmatprep.subr.mxu1 %v532_v17  ;;  %v527_v23 = vld [vmem:[#allocation2 + $0xda0] sm:$0xff]  ;;  %814 = vmatpush1.msra.mxu0 %v403_v18  ;;  %v396_v24 = vld [vmem:[#allocation2 + $0x988] sm:$0xff] }
  0x87   :  { %885 = vmatpush1.msra.mxu1 %v531_v19  ;;  %v524_v25 = vld [vmem:[#allocation2 + $0xd88] sm:$0xff]  ;;  %815 = vmatprep.subr.mxu0 %v400_v20  ;;  %v395_v26 = vld [vmem:[#allocation2 + $0x980] sm:$0xff] }
  0x88   :  { %886 = vmatprep.subr.mxu1 %v528_v21  ;;  %v523_v27 = vld [vmem:[#allocation2 + $0xd80] sm:$0xff]  ;;  %816 = vmatpush1.msra.mxu0 %v399_v22  ;;  %v392_v28 = vld [vmem:[#allocation2 + $0x968] sm:$0xff] }
  0x89   :  { %887 = vmatpush1.msra.mxu1 %v527_v23  ;;  %v520_v29 = vld [vmem:[#allocation2 + $0xd68] sm:$0xff]  ;;  %817 = vmatprep.subr.mxu0 %v396_v24  ;;  %v391_v30 = vld [vmem:[#allocation2 + $0x960] sm:$0xff] }
  0x8a   :  { %888 = vmatprep.subr.mxu1 %v524_v25  ;;  %v519_v31 = vld [vmem:[#allocation2 + $0xd60] sm:$0xff]  ;;  %818 = vmatpush1.msra.mxu0 %v395_v26  ;;  %v388_v32 = vld [vmem:[#allocation2 + $0x948] sm:$0xff] }
  0x8b   :  { %889 = vmatpush1.msra.mxu1 %v523_v27  ;;  %v516_v33 = vld [vmem:[#allocation2 + $0xd48] sm:$0xff]  ;;  %819 = vmatprep.subr.mxu0 %v392_v28  ;;  %v387_v34 = vld [vmem:[#allocation2 + $0x940] sm:$0xff] }
  0x8c   :  { %890 = vmatprep.subr.mxu1 %v520_v29  ;;  %v515_v35 = vld [vmem:[#allocation2 + $0xd40] sm:$0xff]  ;;  %820 = vmatpush1.msra.mxu0 %v391_v30  ;;  %v384_v36 = vld [vmem:[#allocation2 + $0x928] sm:$0xff] }
  0x8d   :  { %891 = vmatpush1.msra.mxu1 %v519_v31  ;;  %v512_v37 = vld [vmem:[#allocation2 + $0xd28] sm:$0xff]  ;;  %821 = vmatprep.subr.mxu0 %v388_v32  ;;  %v383_v38 = vld [vmem:[#allocation2 + $0x920] sm:$0xff] }
  0x8e   :  { %892 = vmatprep.subr.mxu1 %v516_v33  ;;  %v511_v39 = vld [vmem:[#allocation2 + $0xd20] sm:$0xff]  ;;  %822 = vmatpush1.msra.mxu0 %v387_v34  ;;  %v380_v40 = vld [vmem:[#allocation2 + $0x908] sm:$0xff] }
  0x8f   :  { %893 = vmatpush1.msra.mxu1 %v515_v35  ;;  %v508_v42 = vld [vmem:[#allocation2 + $0xd08] sm:$0xff]  ;;  %823 = vmatprep.subr.mxu0 %v384_v36  ;;  %v379_v43 = vld [vmem:[#allocation2 + $0x900] sm:$0xff] }
  0x90   :  { %894 = vmatprep.subr.mxu1 %v512_v37  ;;  %v507_v44 = vld [vmem:[#allocation2 + $0xd00] sm:$0xff]  ;;  %824 = vmatpush1.msra.mxu0 %v383_v38  ;;  %v376_v45 = vld [vmem:[#allocation2 + $0x8e8] sm:$0xff] }
  0x91   :  { %895 = vmatpush1.msra.mxu1 %v511_v39  ;;  %v504_v46 = vld [vmem:[#allocation2 + $0xce8] sm:$0xff]  ;;  %825 = vmatprep.subr.mxu0 %v380_v40  ;;  %v375_v47 = vld [vmem:[#allocation2 + $0x8e0] sm:$0xff] }
  0x92   :  { %896 = vmatprep.subr.mxu1 %v508_v42  ;;  %v503_v48 = vld [vmem:[#allocation2 + $0xce0] sm:$0xff]  ;;  %826 = vmatpush1.msra.mxu0 %v379_v43  ;;  %v372_v49 = vld [vmem:[#allocation2 + $0x8c8] sm:$0xff] }
  0x93   :  { %897 = vmatpush1.msra.mxu1 %v507_v44  ;;  %v500_v50 = vld [vmem:[#allocation2 + $0xcc8] sm:$0xff]  ;;  %827 = vmatprep.subr.mxu0 %v376_v45  ;;  %v371_v51 = vld [vmem:[#allocation2 + $0x8c0] sm:$0xff] }
  0x94   :  { %898 = vmatprep.subr.mxu1 %v504_v46  ;;  %v499_v53 = vld [vmem:[#allocation2 + $0xcc0] sm:$0xff]  ;;  %828 = vmatpush1.msra.mxu0 %v375_v47  ;;  %v368_v54 = vld [vmem:[#allocation2 + $0x8a8] sm:$0xff] }
  0x95   :  { %899 = vmatpush1.msra.mxu1 %v503_v48  ;;  %v496_v55 = vld [vmem:[#allocation2 + $0xca8] sm:$0xff]  ;;  %829 = vmatprep.subr.mxu0 %v372_v49  ;;  %v367_v56 = vld [vmem:[#allocation2 + $0x8a0] sm:$0xff] }
  0x96   :  { %900 = vmatprep.subr.mxu1 %v500_v50  ;;  %v495_v57 = vld [vmem:[#allocation2 + $0xca0] sm:$0xff]  ;;  %830 = vmatpush1.msra.mxu0 %v371_v51  ;;  %v364_v58 = vld [vmem:[#allocation2 + $0x888] sm:$0xff] }
  0x97   :  { %901 = vmatpush1.msra.mxu1 %v499_v53  ;;  %v492_v59 = vld [vmem:[#allocation2 + $0xc88] sm:$0xff]  ;;  %831 = vmatprep.subr.mxu0 %v368_v54  ;;  %v363_v60 = vld [vmem:[#allocation2 + $0x880] sm:$0xff] }
  0x98   :  { %902 = vmatprep.subr.mxu1 %v496_v55  ;;  %v491_v61 = vld [vmem:[#allocation2 + $0xc80] sm:$0xff]  ;;  %832 = vmatpush1.msra.mxu0 %v367_v56  ;;  %v360_v63 = vld [vmem:[#allocation2 + $0x868] sm:$0xff] }
  0x99   :  { %903 = vmatpush1.msra.mxu1 %v495_v57  ;;  %v488_v0 = vld [vmem:[#allocation2 + $0xc68] sm:$0xff]  ;;  %833 = vmatprep.subr.mxu0 %v364_v58  ;;  %v359_v1 = vld [vmem:[#allocation2 + $0x860] sm:$0xff] }
  0x9a   :  { %904 = vmatprep.subr.mxu1 %v492_v59  ;;  %v487_v2 = vld [vmem:[#allocation2 + $0xc60] sm:$0xff]  ;;  %834 = vmatpush1.msra.mxu0 %v363_v60  ;;  %v356_v4 = vld [vmem:[#allocation2 + $0x848] sm:$0xff] }
  0x9b   :  { %905 = vmatpush1.msra.mxu1 %v491_v61  ;;  %v484_v5 = vld [vmem:[#allocation2 + $0xc48] sm:$0xff]  ;;  %835 = vmatprep.subr.mxu0 %v360_v63  ;;  %v355_v6 = vld [vmem:[#allocation2 + $0x840] sm:$0xff] }
  0x9c   :  { %906 = vmatprep.subr.mxu1 %v488_v0  ;;  %v483_v7 = vld [vmem:[#allocation2 + $0xc40] sm:$0xff]  ;;  %836 = vmatpush1.msra.mxu0 %v359_v1  ;;  %v352_v9 = vld [vmem:[#allocation2 + $0x828] sm:$0xff] }
  0x9d   :  { %907 = vmatpush1.msra.mxu1 %v487_v2  ;;  %v480_v10 = vld [vmem:[#allocation2 + $0xc28] sm:$0xff]  ;;  %837 = vmatprep.subr.mxu0 %v356_v4  ;;  %v351_v12 = vld [vmem:[#allocation2 + $0x820] sm:$0xff] }
  0x9e   :  { %908 = vmatprep.subr.mxu1 %v484_v5  ;;  %v479_v13 = vld [vmem:[#allocation2 + $0xc20] sm:$0xff]  ;;  %838 = vmatpush1.msra.mxu0 %v355_v6  ;;  %v348_v14 = vld [vmem:[#allocation2 + $0x808] sm:$0xff] }
  0x9f   :  { %909 = vmatpush1.msra.mxu1 %v483_v7  ;;  %v476_v15 = vld [vmem:[#allocation2 + $0xc08] sm:$0xff]  ;;  %839 = vmatprep.subr.mxu0 %v352_v9  ;;  %v347_v16 = vld [vmem:[#allocation2 + $0x800] sm:$0xff] }
  0xa0   :  { %910 = vmatprep.subr.mxu1 %v480_v10  ;;  %v475_v17 = vld [vmem:[#allocation2 + $0xc00] sm:$0xff]  ;;  %840 = vmatpush1.msra.mxu0 %v351_v12  ;;  %v472_v18 = vld [vmem:[#allocation2 + $0xbe8] sm:$0xff] }
  0xa1   :  { %911 = vmatpush1.msra.mxu1 %v479_v13  ;;  %v600_v19 = vld [vmem:[#allocation2 + $0xfe8] sm:$0xff]  ;;  %841 = vmatprep.subr.mxu0 %v348_v14  ;;  %v471_v20 = vld [vmem:[#allocation2 + $0xbe0] sm:$0xff] }
  0xa2   :  { %912 = vmatprep.subr.mxu1 %v476_v15  ;;  %v599_v21 = vld [vmem:[#allocation2 + $0xfe0] sm:$0xff]  ;;  %842 = vmatpush1.msra.mxu0 %v347_v16  ;;  %v468_v22 = vld [vmem:[#allocation2 + $0xbc8] sm:$0xff] }
  0xa3   :  { %913 = vmatpush1.msra.mxu1 %v475_v17  ;;  %v596_v23 = vld [vmem:[#allocation2 + $0xfc8] sm:$0xff]  ;;  %843 = vmatprep.subr.mxu0 %v472_v18  ;;  %v467_v24 = vld [vmem:[#allocation2 + $0xbc0] sm:$0xff] }
  0xa4   :  { %914 = vmatprep.subr.mxu1 %v600_v19  ;;  %v595_v25 = vld [vmem:[#allocation2 + $0xfc0] sm:$0xff]  ;;  %844 = vmatpush2.msra.mxu0 %v471_v20  ;;  %v464_v26 = vld [vmem:[#allocation2 + $0xba8] sm:$0xff] }
  0xa5   :  { %915 = vmatpush2.msra.mxu1 %v599_v21  ;;  %v592_v27 = vld [vmem:[#allocation2 + $0xfa8] sm:$0xff]  ;;  %845 = vmatprep.subr.mxu0 %v468_v22  ;;  %v463_v28 = vld [vmem:[#allocation2 + $0xba0] sm:$0xff] }
  0xa6   :  { %916 = vmatprep.subr.mxu1 %v596_v23  ;;  %v591_v29 = vld [vmem:[#allocation2 + $0xfa0] sm:$0xff]  ;;  %846 = vmatpush2.msra.mxu0 %v467_v24  ;;  %v460_v30 = vld [vmem:[#allocation2 + $0xb88] sm:$0xff] }
  0xa7   :  { %917 = vmatpush2.msra.mxu1 %v595_v25  ;;  %v588_v31 = vld [vmem:[#allocation2 + $0xf88] sm:$0xff]  ;;  %847 = vmatprep.subr.mxu0 %v464_v26  ;;  %v459_v32 = vld [vmem:[#allocation2 + $0xb80] sm:$0xff] }
  0xa8   :  { %918 = vmatprep.subr.mxu1 %v592_v27  ;;  %v587_v33 = vld [vmem:[#allocation2 + $0xf80] sm:$0xff]  ;;  %848 = vmatpush2.msra.mxu0 %v463_v28  ;;  %v456_v34 = vld [vmem:[#allocation2 + $0xb68] sm:$0xff] }
  0xa9   :  { %919 = vmatpush2.msra.mxu1 %v591_v29  ;;  %v584_v35 = vld [vmem:[#allocation2 + $0xf68] sm:$0xff]  ;;  %849 = vmatprep.subr.mxu0 %v460_v30  ;;  %v455_v36 = vld [vmem:[#allocation2 + $0xb60] sm:$0xff]  ;;  %v154_v29 = vld [vmem:[#allocation2 + $0x1f8] sm:$0xff] }
  0xaa   :  { %920 = vmatprep.subr.mxu1 %v588_v31  ;;  %v583_v37 = vld [vmem:[#allocation2 + $0xf60] sm:$0xff]  ;;  %850 = vmatpush2.msra.mxu0 %v459_v32  ;;  %v452_v38 = vld [vmem:[#allocation2 + $0xb48] sm:$0xff]  ;;  %v282_v30 = vld [vmem:[#allocation2 + $0x5f8] sm:$0xff] }
  0xab   :  { %921 = vmatpush2.msra.mxu1 %v587_v33  ;;  %v580_v39 = vld [vmem:[#allocation2 + $0xf48] sm:$0xff]  ;;  %851 = vmatprep.subr.mxu0 %v456_v34  ;;  %v451_v40 = vld [vmem:[#allocation2 + $0xb40] sm:$0xff]  ;;  %v153_v31 = vld [vmem:[#allocation2 + $0x1f0] sm:$0xff] }
  0xac   :  { %922 = vmatprep.subr.mxu1 %v584_v35  ;;  %v579_v42 = vld [vmem:[#allocation2 + $0xf40] sm:$0xff]  ;;  %852 = vmatpush2.msra.mxu0 %v455_v36  ;;  %v448_v43 = vld [vmem:[#allocation2 + $0xb28] sm:$0xff]  ;;  %v281_v32 = vld [vmem:[#allocation2 + $0x5f0] sm:$0xff] }
  0xad   :  { %923 = vmatpush2.msra.mxu1 %v583_v37  ;;  %v576_v44 = vld [vmem:[#allocation2 + $0xf28] sm:$0xff]  ;;  %853 = vmatprep.subr.mxu0 %v452_v38  ;;  %v447_v45 = vld [vmem:[#allocation2 + $0xb20] sm:$0xff]  ;;  %v150_v33 = vld [vmem:[#allocation2 + $0x1d8] sm:$0xff] }
  0xae   :  { %924 = vmatprep.subr.mxu1 %v580_v39  ;;  %v575_v46 = vld [vmem:[#allocation2 + $0xf20] sm:$0xff]  ;;  %854 = vmatpush2.msra.mxu0 %v451_v40  ;;  %v444_v47 = vld [vmem:[#allocation2 + $0xb08] sm:$0xff]  ;;  %v278_v34 = vld [vmem:[#allocation2 + $0x5d8] sm:$0xff] }
  0xaf   :  { %925 = vmatpush2.msra.mxu1 %v579_v42  ;;  %v572_v48 = vld [vmem:[#allocation2 + $0xf08] sm:$0xff]  ;;  %855 = vmatprep.subr.mxu0 %v448_v43  ;;  %v443_v49 = vld [vmem:[#allocation2 + $0xb00] sm:$0xff]  ;;  %v149_v35 = vld [vmem:[#allocation2 + $0x1d0] sm:$0xff] }
  0xb0   :  { %926 = vmatprep.subr.mxu1 %v576_v44  ;;  %v571_v50 = vld [vmem:[#allocation2 + $0xf00] sm:$0xff]  ;;  %856 = vmatpush2.msra.mxu0 %v447_v45  ;;  %v440_v51 = vld [vmem:[#allocation2 + $0xae8] sm:$0xff]  ;;  %v277_v36 = vld [vmem:[#allocation2 + $0x5d0] sm:$0xff] }
  0xb1   :  { %927 = vmatpush2.msra.mxu1 %v575_v46  ;;  %v568_v53 = vld [vmem:[#allocation2 + $0xee8] sm:$0xff]  ;;  %857 = vmatprep.subr.mxu0 %v444_v47  ;;  %v439_v54 = vld [vmem:[#allocation2 + $0xae0] sm:$0xff]  ;;  %v146_v37 = vld [vmem:[#allocation2 + $0x1b8] sm:$0xff] }
  0xb2   :  { %928 = vmatprep.subr.mxu1 %v572_v48  ;;  %v567_v55 = vld [vmem:[#allocation2 + $0xee0] sm:$0xff]  ;;  %858 = vmatpush2.msra.mxu0 %v443_v49  ;;  %v436_v56 = vld [vmem:[#allocation2 + $0xac8] sm:$0xff]  ;;  %v274_v38 = vld [vmem:[#allocation2 + $0x5b8] sm:$0xff] }
  0xb3   :  { %929 = vmatpush2.msra.mxu1 %v571_v50  ;;  %v564_v57 = vld [vmem:[#allocation2 + $0xec8] sm:$0xff]  ;;  %859 = vmatprep.subr.mxu0 %v440_v51  ;;  %v435_v58 = vld [vmem:[#allocation2 + $0xac0] sm:$0xff]  ;;  %v145_v39 = vld [vmem:[#allocation2 + $0x1b0] sm:$0xff] }
  0xb4   :  { %930 = vmatprep.subr.mxu1 %v568_v53  ;;  %v563_v59 = vld [vmem:[#allocation2 + $0xec0] sm:$0xff]  ;;  %860 = vmatpush2.msra.mxu0 %v439_v54  ;;  %v432_v60 = vld [vmem:[#allocation2 + $0xaa8] sm:$0xff]  ;;  %v273_v40 = vld [vmem:[#allocation2 + $0x5b0] sm:$0xff] }
  0xb5   :  { %931 = vmatpush2.msra.mxu1 %v567_v55  ;;  %v560_v61 = vld [vmem:[#allocation2 + $0xea8] sm:$0xff]  ;;  %861 = vmatprep.subr.mxu0 %v436_v56  ;;  %v431_v63 = vld [vmem:[#allocation2 + $0xaa0] sm:$0xff]  ;;  %v142_v42 = vld [vmem:[#allocation2 + $0x198] sm:$0xff] }
  0xb6   :  { %932 = vmatprep.subr.mxu1 %v564_v57  ;;  %v559_v0 = vld [vmem:[#allocation2 + $0xea0] sm:$0xff]  ;;  %v90_v1 = vld [vmem:[%s2076_s0 + $0x8] sm:$0xff]  ;;  %862 = vmatpush2.msra.mxu0 %v435_v58  ;;  %v270_v43 = vld [vmem:[#allocation2 + $0x598] sm:$0xff] }
  0xb7   :  { %933 = vmatpush2.msra.mxu1 %v563_v59  ;;  %v428_v2 = vld [vmem:[#allocation2 + $0xa88] sm:$0xff]  ;;  %863 = vmatprep.subr.mxu0 %v432_v60  ;;  %v427_v5 = vld [vmem:[#allocation2 + $0xa80] sm:$0xff]  ;;  %v644_v10 = vcombine.high %v90_v1, %v90_v1  ;;  %v1934_v16 = vrot.slane %v90_v1, %v1910_v52  ;;  %v141_v44 = vld [vmem:[#allocation2 + $0x190] sm:$0xff] }
  0xb8   :  { %v556_v4 = vld [vmem:[#allocation2 + $0xe88] sm:$0xff]  ;;  %934 = vmatprep.subr.mxu1 %v560_v61  ;;  %v555_v6 = vld [vmem:[#allocation2 + $0xe80] sm:$0xff]  ;;  %864 = vmatpush2.msra.mxu0 %v431_v63  ;;  %v269_v45 = vld [vmem:[#allocation2 + $0x590] sm:$0xff] }
  0xb9   :  { %935 = vmatpush2.msra.mxu1 %v559_v0  ;;  %v424_v7 = vld [vmem:[#allocation2 + $0xa68] sm:$0xff]  ;;  %865 = vmatprep.subr.mxu0 %v428_v2  ;;  %v423_v12 = vld [vmem:[#allocation2 + $0xa60] sm:$0xff]  ;;  %v1937_v21 = vrot.slane %v644_v10, %v1910_v52  ;;  %v1941_v26 = vcombine.high %v1934_v16, %v1934_v16  ;;  %v138_v46 = vld [vmem:[#allocation2 + $0x178] sm:$0xff] }
  0xba   :  { %v552_v9 = vld [vmem:[#allocation2 + $0xe68] sm:$0xff]  ;;  %936 = vmatprep.subr.mxu1 %v556_v4  ;;  %v551_v13 = vld [vmem:[#allocation2 + $0xe60] sm:$0xff]  ;;  %866 = vmatpush2.msra.mxu0 %v427_v5  ;;  %v266_v47 = vld [vmem:[#allocation2 + $0x578] sm:$0xff] }
  0xbb   :  { %937 = vmatpush2.msra.mxu1 %v555_v6  ;;  %v420_v14 = vld [vmem:[#allocation2 + $0xa48] sm:$0xff]  ;;  %867 = vmatprep.subr.mxu0 %v424_v7  ;;  %v419_v17 = vld [vmem:[#allocation2 + $0xa40] sm:$0xff]  ;;  %v1945_v52 = vcombine.high %v1937_v21, %v1937_v21  ;;  %v137_v48 = vld [vmem:[#allocation2 + $0x170] sm:$0xff] }
  0xbc   :  { %v548_v15 = vld [vmem:[#allocation2 + $0xe48] sm:$0xff]  ;;  %938 = vmatprep.subr.mxu1 %v552_v9  ;;  %v547_v18 = vld [vmem:[#allocation2 + $0xe40] sm:$0xff]  ;;  %868 = vmatpush2.msra.mxu0 %v423_v12  ;;  %v265_v49 = vld [vmem:[#allocation2 + $0x570] sm:$0xff] }
  0xbd   :  { %939 = vmatpush2.msra.mxu1 %v551_v13  ;;  %v416_v19 = vld [vmem:[#allocation2 + $0xa28] sm:$0xff]  ;;  %869 = vmatprep.subr.mxu0 %v420_v14  ;;  %v415_v22 = vld [vmem:[#allocation2 + $0xa20] sm:$0xff]  ;;  %v134_v50 = vld [vmem:[#allocation2 + $0x158] sm:$0xff] }
  0xbe   :  { %v544_v20 = vld [vmem:[#allocation2 + $0xe28] sm:$0xff]  ;;  %940 = vmatprep.subr.mxu1 %v548_v15  ;;  %v543_v23 = vld [vmem:[#allocation2 + $0xe20] sm:$0xff]  ;;  %870 = vmatpush2.msra.mxu0 %v419_v17  ;;  %v262_v51 = vld [vmem:[#allocation2 + $0x558] sm:$0xff] }
  0xbf   :  { %941 = vmatpush2.msra.mxu1 %v547_v18  ;;  %v412_v24 = vld [vmem:[#allocation2 + $0xa08] sm:$0xff]  ;;  %871 = vmatprep.subr.mxu0 %v416_v19  ;;  %v411_v27 = vld [vmem:[#allocation2 + $0xa00] sm:$0xff]  ;;  %v133_v53 = vld [vmem:[#allocation2 + $0x150] sm:$0xff] }
  0xc0   :  { %v540_v25 = vld [vmem:[#allocation2 + $0xe08] sm:$0xff]  ;;  %942 = vmatprep.subr.mxu1 %v544_v20  ;;  %872 = vmatpush2.msra.mxu0 %v415_v22  ;;  %v539_v28 = vld [vmem:[#allocation2 + $0xe00] sm:$0xff]  ;;  %v261_v54 = vld [vmem:[#allocation2 + $0x550] sm:$0xff] }
  0xc1   :  { %943 = vmatpush2.msra.mxu1 %v543_v23  ;;  %873 = vmatprep.subr.mxu0 %v412_v24  ;;  %v130_v55 = vld [vmem:[#allocation2 + $0x138] sm:$0xff]  ;;  %v129_v57 = vld [vmem:[#allocation2 + $0x130] sm:$0xff] }
  0xc2   :  { %944 = vmatprep.subr.mxu1 %v540_v25  ;;  %874 = vmatpush2.msra.mxu0 %v411_v27  ;;  %v258_v56 = vld [vmem:[#allocation2 + $0x538] sm:$0xff]  ;;  %v257_v58 = vld [vmem:[#allocation2 + $0x530] sm:$0xff] }
  0xc3   :  { %875 = vmatprep.mubr.f32.mxu0 %v1941_v26  ;;  %945 = vmatpush2.msra.mxu1 %v539_v28  ;;  %v126_v59 = vld [vmem:[#allocation2 + $0x118] sm:$0xff]  ;;  %v125_v61 = vld [vmem:[#allocation2 + $0x110] sm:$0xff] }
  0xc4   :  { %876 = vmatmul.mubr.f32.vlgmr.msra.gmra.mxu0 %v1934_v16  ;;  %946 = vmatprep.mubr.f32.mxu1 %v1945_v52  ;;  %v254_v60 = vld [vmem:[#allocation2 + $0x518] sm:$0xff]  ;;  %v253_v63 = vld [vmem:[#allocation2 + $0x510] sm:$0xff] }
  0xc5   :  { %953 = vmatprep.subr.mxu0 %v154_v29  ;;  %1024 = vmatprep.subr.mxu1 %v282_v30  ;;  %v122_v0 = vld [vmem:[#allocation2 + $0xf8] sm:$0xff]  ;;  %v121_v2 = vld [vmem:[#allocation2 + $0xf0] sm:$0xff] }
  0xc6   :  { %947 = vmatmul.mubr.f32.vlgmr.msra.gmra.mxu1 %v1937_v21  ;;  %954 = vmatpush1.msra.mxu0 %v153_v31  ;;  %v250_v1 = vld [vmem:[#allocation2 + $0x4f8] sm:$0xff]  ;;  %v249_v4 = vld [vmem:[#allocation2 + $0x4f0] sm:$0xff] }
  0xc7   :  { %1025 = vmatpush1.msra.mxu1 %v281_v32  ;;  %955 = vmatprep.subr.mxu0 %v150_v33  ;;  %v118_v5 = vld [vmem:[#allocation2 + $0xd8] sm:$0xff]  ;;  %v117_v7 = vld [vmem:[#allocation2 + $0xd0] sm:$0xff] }
  0xc8   :  { %1026 = vmatprep.subr.mxu1 %v278_v34  ;;  %956 = vmatpush1.msra.mxu0 %v149_v35  ;;  %v246_v6 = vld [vmem:[#allocation2 + $0x4d8] sm:$0xff]  ;;  %v245_v9 = vld [vmem:[#allocation2 + $0x4d0] sm:$0xff] }
  0xc9   :  { %1027 = vmatpush1.msra.mxu1 %v277_v36  ;;  %957 = vmatprep.subr.mxu0 %v146_v37  ;;  %v114_v10 = vld [vmem:[#allocation2 + $0xb8] sm:$0xff]  ;;  %v113_v13 = vld [vmem:[#allocation2 + $0xb0] sm:$0xff] }
  0xca   :  { %1028 = vmatprep.subr.mxu1 %v274_v38  ;;  %958 = vmatpush1.msra.mxu0 %v145_v39  ;;  %v242_v12 = vld [vmem:[#allocation2 + $0x4b8] sm:$0xff]  ;;  %v241_v14 = vld [vmem:[#allocation2 + $0x4b0] sm:$0xff] }
  0xcb   :  { %1029 = vmatpush1.msra.mxu1 %v273_v40  ;;  %959 = vmatprep.subr.mxu0 %v142_v42  ;;  %v110_v15 = vld [vmem:[#allocation2 + $0x98] sm:$0xff]  ;;  %v109_v18 = vld [vmem:[#allocation2 + $0x90] sm:$0xff] }
  0xcc   :  { %1030 = vmatprep.subr.mxu1 %v270_v43  ;;  %960 = vmatpush1.msra.mxu0 %v141_v44  ;;  %v238_v17 = vld [vmem:[#allocation2 + $0x498] sm:$0xff]  ;;  %v237_v19 = vld [vmem:[#allocation2 + $0x490] sm:$0xff] }
  0xcd   :  { %1031 = vmatpush1.msra.mxu1 %v269_v45  ;;  %961 = vmatprep.subr.mxu0 %v138_v46  ;;  %v106_v20 = vld [vmem:[#allocation2 + $0x78] sm:$0xff]  ;;  %v105_v23 = vld [vmem:[#allocation2 + $0x70] sm:$0xff] }
  0xce   :  { %1032 = vmatprep.subr.mxu1 %v266_v47  ;;  %962 = vmatpush1.msra.mxu0 %v137_v48  ;;  %v234_v22 = vld [vmem:[#allocation2 + $0x478] sm:$0xff]  ;;  %v233_v24 = vld [vmem:[#allocation2 + $0x470] sm:$0xff] }
  0xcf   :  { %1033 = vmatpush1.msra.mxu1 %v265_v49  ;;  %963 = vmatprep.subr.mxu0 %v134_v50  ;;  %v102_v25 = vld [vmem:[#allocation2 + $0x58] sm:$0xff]  ;;  %v101_v28 = vld [vmem:[#allocation2 + $0x50] sm:$0xff] }
  0xd0   :  { %1034 = vmatprep.subr.mxu1 %v262_v51  ;;  %964 = vmatpush1.msra.mxu0 %v133_v53  ;;  %v230_v27 = vld [vmem:[#allocation2 + $0x458] sm:$0xff]  ;;  %v229_v29 = vld [vmem:[#allocation2 + $0x450] sm:$0xff] }
  0xd1   :  { %1035 = vmatpush1.msra.mxu1 %v261_v54  ;;  %965 = vmatprep.subr.mxu0 %v130_v55  ;;  %v98_v30 = vld [vmem:[#allocation2 + $0x38] sm:$0xff]  ;;  %v97_v32 = vld [vmem:[#allocation2 + $0x30] sm:$0xff] }
  0xd2   :  { %1036 = vmatprep.subr.mxu1 %v258_v56  ;;  %966 = vmatpush1.msra.mxu0 %v129_v57  ;;  %v226_v31 = vld [vmem:[#allocation2 + $0x438] sm:$0xff]  ;;  %v225_v33 = vld [vmem:[#allocation2 + $0x430] sm:$0xff] }
  0xd3   :  { %1037 = vmatpush1.msra.mxu1 %v257_v58  ;;  %967 = vmatprep.subr.mxu0 %v126_v59  ;;  %v94_v34 = vld [vmem:[#allocation2 + $0x18] sm:$0xff]  ;;  %v93_v36 = vld [vmem:[#allocation2 + $0x10] sm:$0xff] }
  0xd4   :  { %1038 = vmatprep.subr.mxu1 %v254_v60  ;;  %968 = vmatpush1.msra.mxu0 %v125_v61  ;;  %v222_v35 = vld [vmem:[#allocation2 + $0x418] sm:$0xff]  ;;  %v221_v37 = vld [vmem:[#allocation2 + $0x410] sm:$0xff] }
  0xd5   :  { %1039 = vmatpush1.msra.mxu1 %v253_v63  ;;  %969 = vmatprep.subr.mxu0 %v122_v0  ;;  %v218_v38 = vld [vmem:[#allocation2 + $0x3f8] sm:$0xff]  ;;  %v217_v40 = vld [vmem:[#allocation2 + $0x3f0] sm:$0xff] }
  0xd6   :  { %1040 = vmatprep.subr.mxu1 %v250_v1  ;;  %970 = vmatpush1.msra.mxu0 %v121_v2  ;;  %v346_v39 = vld [vmem:[#allocation2 + $0x7f8] sm:$0xff]  ;;  %v345_v42 = vld [vmem:[#allocation2 + $0x7f0] sm:$0xff] }
  0xd7   :  { %1041 = vmatpush1.msra.mxu1 %v249_v4  ;;  %971 = vmatprep.subr.mxu0 %v118_v5  ;;  %v214_v43 = vld [vmem:[#allocation2 + $0x3d8] sm:$0xff]  ;;  %v213_v45 = vld [vmem:[#allocation2 + $0x3d0] sm:$0xff] }
  0xd8   :  { %1042 = vmatprep.subr.mxu1 %v246_v6  ;;  %972 = vmatpush1.msra.mxu0 %v117_v7  ;;  %v342_v44 = vld [vmem:[#allocation2 + $0x7d8] sm:$0xff]  ;;  %v341_v46 = vld [vmem:[#allocation2 + $0x7d0] sm:$0xff] }
  0xd9   :  { %1043 = vmatpush1.msra.mxu1 %v245_v9  ;;  %973 = vmatprep.subr.mxu0 %v114_v10  ;;  %v210_v47 = vld [vmem:[#allocation2 + $0x3b8] sm:$0xff]  ;;  %v209_v49 = vld [vmem:[#allocation2 + $0x3b0] sm:$0xff] }
  0xda   :  { %1044 = vmatprep.subr.mxu1 %v242_v12  ;;  %974 = vmatpush1.msra.mxu0 %v113_v13  ;;  %v338_v48 = vld [vmem:[#allocation2 + $0x7b8] sm:$0xff]  ;;  %v337_v50 = vld [vmem:[#allocation2 + $0x7b0] sm:$0xff] }
  0xdb   :  { %1045 = vmatpush1.msra.mxu1 %v241_v14  ;;  %975 = vmatprep.subr.mxu0 %v110_v15  ;;  %v206_v51 = vld [vmem:[#allocation2 + $0x398] sm:$0xff]  ;;  %v205_v54 = vld [vmem:[#allocation2 + $0x390] sm:$0xff] }
  0xdc   :  { %1046 = vmatprep.subr.mxu1 %v238_v17  ;;  %976 = vmatpush1.msra.mxu0 %v109_v18  ;;  %v334_v53 = vld [vmem:[#allocation2 + $0x798] sm:$0xff]  ;;  %v333_v55 = vld [vmem:[#allocation2 + $0x790] sm:$0xff] }
  0xdd   :  { %1047 = vmatpush1.msra.mxu1 %v237_v19  ;;  %977 = vmatprep.subr.mxu0 %v106_v20  ;;  %v202_v56 = vld [vmem:[#allocation2 + $0x378] sm:$0xff]  ;;  %v201_v58 = vld [vmem:[#allocation2 + $0x370] sm:$0xff] }
  0xde   :  { %1048 = vmatprep.subr.mxu1 %v234_v22  ;;  %978 = vmatpush1.msra.mxu0 %v105_v23  ;;  %v330_v57 = vld [vmem:[#allocation2 + $0x778] sm:$0xff]  ;;  %v329_v59 = vld [vmem:[#allocation2 + $0x770] sm:$0xff] }
  0xdf   :  { %1049 = vmatpush1.msra.mxu1 %v233_v24  ;;  %979 = vmatprep.subr.mxu0 %v102_v25  ;;  %v198_v60 = vld [vmem:[#allocation2 + $0x358] sm:$0xff]  ;;  %v197_v63 = vld [vmem:[#allocation2 + $0x350] sm:$0xff] }
  0xe0   :  { %1050 = vmatprep.subr.mxu1 %v230_v27  ;;  %980 = vmatpush1.msra.mxu0 %v101_v28  ;;  %v326_v61 = vld [vmem:[#allocation2 + $0x758] sm:$0xff]  ;;  %v325_v0 = vld [vmem:[#allocation2 + $0x750] sm:$0xff] }
  0xe1   :  { %1051 = vmatpush1.msra.mxu1 %v229_v29  ;;  %981 = vmatprep.subr.mxu0 %v98_v30  ;;  %v194_v1 = vld [vmem:[#allocation2 + $0x338] sm:$0xff]  ;;  %v193_v4 = vld [vmem:[#allocation2 + $0x330] sm:$0xff] }
  0xe2   :  { %1052 = vmatprep.subr.mxu1 %v226_v31  ;;  %982 = vmatpush1.msra.mxu0 %v97_v32  ;;  %v322_v2 = vld [vmem:[#allocation2 + $0x738] sm:$0xff]  ;;  %v321_v5 = vld [vmem:[#allocation2 + $0x730] sm:$0xff] }
  0xe3   :  { %1053 = vmatpush1.msra.mxu1 %v225_v33  ;;  %983 = vmatprep.subr.mxu0 %v94_v34  ;;  %v190_v6 = vld [vmem:[#allocation2 + $0x318] sm:$0xff]  ;;  %v189_v9 = vld [vmem:[#allocation2 + $0x310] sm:$0xff] }
  0xe4   :  { %1054 = vmatprep.subr.mxu1 %v222_v35  ;;  %984 = vmatpush1.msra.mxu0 %v93_v36  ;;  %v318_v7 = vld [vmem:[#allocation2 + $0x718] sm:$0xff]  ;;  %v317_v10 = vld [vmem:[#allocation2 + $0x710] sm:$0xff] }
  0xe5   :  { %1055 = vmatpush1.msra.mxu1 %v221_v37  ;;  %985 = vmatprep.subr.mxu0 %v218_v38  ;;  %v186_v12 = vld [vmem:[#allocation2 + $0x2f8] sm:$0xff]  ;;  %v185_v14 = vld [vmem:[#allocation2 + $0x2f0] sm:$0xff] }
  0xe6   :  { %1056 = vmatprep.subr.mxu1 %v346_v39  ;;  %986 = vmatpush2.msra.mxu0 %v217_v40  ;;  %v314_v13 = vld [vmem:[#allocation2 + $0x6f8] sm:$0xff]  ;;  %v313_v15 = vld [vmem:[#allocation2 + $0x6f0] sm:$0xff] }
  0xe7   :  { %1057 = vmatpush2.msra.mxu1 %v345_v42  ;;  %987 = vmatprep.subr.mxu0 %v214_v43  ;;  %v182_v17 = vld [vmem:[#allocation2 + $0x2d8] sm:$0xff]  ;;  %v181_v19 = vld [vmem:[#allocation2 + $0x2d0] sm:$0xff] }
  0xe8   :  { %1058 = vmatprep.subr.mxu1 %v342_v44  ;;  %988 = vmatpush2.msra.mxu0 %v213_v45  ;;  %v310_v18 = vld [vmem:[#allocation2 + $0x6d8] sm:$0xff]  ;;  %v309_v20 = vld [vmem:[#allocation2 + $0x6d0] sm:$0xff] }
  0xe9   :  { %1059 = vmatpush2.msra.mxu1 %v341_v46  ;;  %989 = vmatprep.subr.mxu0 %v210_v47  ;;  %v178_v22 = vld [vmem:[#allocation2 + $0x2b8] sm:$0xff]  ;;  %v177_v24 = vld [vmem:[#allocation2 + $0x2b0] sm:$0xff] }
  0xea   :  { %1060 = vmatprep.subr.mxu1 %v338_v48  ;;  %990 = vmatpush2.msra.mxu0 %v209_v49  ;;  %v306_v23 = vld [vmem:[#allocation2 + $0x6b8] sm:$0xff]  ;;  %v305_v25 = vld [vmem:[#allocation2 + $0x6b0] sm:$0xff] }
  0xeb   :  { %1061 = vmatpush2.msra.mxu1 %v337_v50  ;;  %991 = vmatprep.subr.mxu0 %v206_v51  ;;  %v174_v27 = vld [vmem:[#allocation2 + $0x298] sm:$0xff]  ;;  %v173_v29 = vld [vmem:[#allocation2 + $0x290] sm:$0xff] }
  0xec   :  { %1062 = vmatprep.subr.mxu1 %v334_v53  ;;  %992 = vmatpush2.msra.mxu0 %v205_v54  ;;  %v302_v28 = vld [vmem:[#allocation2 + $0x698] sm:$0xff]  ;;  %v301_v30 = vld [vmem:[#allocation2 + $0x690] sm:$0xff] }
  0xed   :  { %1063 = vmatpush2.msra.mxu1 %v333_v55  ;;  %993 = vmatprep.subr.mxu0 %v202_v56  ;;  %v170_v31 = vld [vmem:[#allocation2 + $0x278] sm:$0xff]  ;;  %v169_v33 = vld [vmem:[#allocation2 + $0x270] sm:$0xff] }
  0xee   :  { %1064 = vmatprep.subr.mxu1 %v330_v57  ;;  %994 = vmatpush2.msra.mxu0 %v201_v58  ;;  %v298_v32 = vld [vmem:[#allocation2 + $0x678] sm:$0xff]  ;;  %v297_v34 = vld [vmem:[#allocation2 + $0x670] sm:$0xff] }
  0xef   :  { %1065 = vmatpush2.msra.mxu1 %v329_v59  ;;  %995 = vmatprep.subr.mxu0 %v198_v60  ;;  %v166_v35 = vld [vmem:[#allocation2 + $0x258] sm:$0xff]  ;;  %v165_v37 = vld [vmem:[#allocation2 + $0x250] sm:$0xff] }
  0xf0   :  { %1066 = vmatprep.subr.mxu1 %v326_v61  ;;  %996 = vmatpush2.msra.mxu0 %v197_v63  ;;  %v294_v36 = vld [vmem:[#allocation2 + $0x658] sm:$0xff]  ;;  %v293_v38 = vld [vmem:[#allocation2 + $0x650] sm:$0xff] }
  0xf1   :  { %1067 = vmatpush2.msra.mxu1 %v325_v0  ;;  %997 = vmatprep.subr.mxu0 %v194_v1  ;;  %v162_v39 = vld [vmem:[#allocation2 + $0x238] sm:$0xff]  ;;  %v161_v42 = vld [vmem:[#allocation2 + $0x230] sm:$0xff] }
  0xf2   :  { %1068 = vmatprep.subr.mxu1 %v322_v2  ;;  %998 = vmatpush2.msra.mxu0 %v193_v4  ;;  %v290_v40 = vld [vmem:[#allocation2 + $0x638] sm:$0xff]  ;;  %v289_v43 = vld [vmem:[#allocation2 + $0x630] sm:$0xff] }
  0xf3   :  { %1069 = vmatpush2.msra.mxu1 %v321_v5  ;;  %999 = vmatprep.subr.mxu0 %v190_v6  ;;  %v158_v44 = vld [vmem:[#allocation2 + $0x218] sm:$0xff]  ;;  %v157_v46 = vld [vmem:[#allocation2 + $0x210] sm:$0xff] }
  0xf4   :  { %1070 = vmatprep.subr.mxu1 %v318_v7  ;;  %1000 = vmatpush2.msra.mxu0 %v189_v9  ;;  %v286_v45 = vld [vmem:[#allocation2 + $0x618] sm:$0xff]  ;;  %v285_v47 = vld [vmem:[#allocation2 + $0x610] sm:$0xff] }
  0xf5   :  { %1071 = vmatpush2.msra.mxu1 %v317_v10  ;;  %1001 = vmatprep.subr.mxu0 %v186_v12  ;;  %v410_v48 = vld [vmem:[#allocation2 + $0x9f8] sm:$0xff]  ;;  %v409_v50 = vld [vmem:[#allocation2 + $0x9f0] sm:$0xff] }
  0xf6   :  { %1072 = vmatprep.subr.mxu1 %v314_v13  ;;  %1002 = vmatpush2.msra.mxu0 %v185_v14  ;;  %v538_v49 = vld [vmem:[#allocation2 + $0xdf8] sm:$0xff]  ;;  %v537_v51 = vld [vmem:[#allocation2 + $0xdf0] sm:$0xff] }
  0xf7   :  { %1073 = vmatpush2.msra.mxu1 %v313_v15  ;;  %1003 = vmatprep.subr.mxu0 %v182_v17  ;;  %v406_v53 = vld [vmem:[#allocation2 + $0x9d8] sm:$0xff]  ;;  %v405_v55 = vld [vmem:[#allocation2 + $0x9d0] sm:$0xff] }
  0xf8   :  { %1074 = vmatprep.subr.mxu1 %v310_v18  ;;  %1004 = vmatpush2.msra.mxu0 %v181_v19  ;;  %v534_v54 = vld [vmem:[#allocation2 + $0xdd8] sm:$0xff]  ;;  %v533_v56 = vld [vmem:[#allocation2 + $0xdd0] sm:$0xff] }
  0xf9   :  { %1075 = vmatpush2.msra.mxu1 %v309_v20  ;;  %1005 = vmatprep.subr.mxu0 %v178_v22  ;;  %v402_v57 = vld [vmem:[#allocation2 + $0x9b8] sm:$0xff]  ;;  %v401_v58 = vld [vmem:[#allocation2 + $0x9b0] sm:$0xff] }
  0xfa   :  { %1076 = vmatprep.subr.mxu1 %v306_v23  ;;  %1006 = vmatpush2.msra.mxu0 %v177_v24  ;;  %v398_v59 = vld [vmem:[#allocation2 + $0x998] sm:$0xff]  ;;  %v397_v60 = vld [vmem:[#allocation2 + $0x990] sm:$0xff] }
  0xfb   :  { %1077 = vmatpush2.msra.mxu1 %v305_v25  ;;  %1007 = vmatprep.subr.mxu0 %v174_v27  ;;  %v525_v61 = vld [vmem:[#allocation2 + $0xd90] sm:$0xff]  ;;  %v522_v63 = vld [vmem:[#allocation2 + $0xd78] sm:$0xff] }
  0xfc   :  { %1078 = vmatprep.subr.mxu1 %v302_v28  ;;  %1008 = vmatpush2.msra.mxu0 %v173_v29  ;;  %v393_v0 = vld [vmem:[#allocation2 + $0x970] sm:$0xff]  ;;  %v390_v2 = vld [vmem:[#allocation2 + $0x958] sm:$0xff] }
  0xfd   :  { %1079 = vmatpush2.msra.mxu1 %v301_v30  ;;  %1009 = vmatprep.subr.mxu0 %v170_v31  ;;  %v521_v1 = vld [vmem:[#allocation2 + $0xd70] sm:$0xff]  ;;  %v518_v4 = vld [vmem:[#allocation2 + $0xd58] sm:$0xff] }
  0xfe   :  { %1080 = vmatprep.subr.mxu1 %v298_v32  ;;  %1010 = vmatpush2.msra.mxu0 %v169_v33  ;;  %v389_v5 = vld [vmem:[#allocation2 + $0x950] sm:$0xff]  ;;  %v386_v7 = vld [vmem:[#allocation2 + $0x938] sm:$0xff] }
  0xff   :  { %1081 = vmatpush2.msra.mxu1 %v297_v34  ;;  %1011 = vmatprep.subr.mxu0 %v166_v35  ;;  %v517_v6 = vld [vmem:[#allocation2 + $0xd50] sm:$0xff]  ;;  %v514_v9 = vld [vmem:[#allocation2 + $0xd38] sm:$0xff] }
 0x100   :  { %1082 = vmatprep.subr.mxu1 %v294_v36  ;;  %1012 = vmatpush2.msra.mxu0 %v165_v37  ;;  %v385_v10 = vld [vmem:[#allocation2 + $0x930] sm:$0xff]  ;;  %v382_v13 = vld [vmem:[#allocation2 + $0x918] sm:$0xff] }
 0x101   :  { %1083 = vmatpush2.msra.mxu1 %v293_v38  ;;  %1013 = vmatprep.subr.mxu0 %v162_v39  ;;  %v513_v12 = vld [vmem:[#allocation2 + $0xd30] sm:$0xff]  ;;  %v510_v14 = vld [vmem:[#allocation2 + $0xd18] sm:$0xff] }
 0x102   :  { %1084 = vmatprep.subr.mxu1 %v290_v40  ;;  %1014 = vmatpush2.msra.mxu0 %v161_v42  ;;  %v381_v15 = vld [vmem:[#allocation2 + $0x910] sm:$0xff]  ;;  %v378_v18 = vld [vmem:[#allocation2 + $0x8f8] sm:$0xff] }
 0x103   :  { %1085 = vmatpush2.msra.mxu1 %v289_v43  ;;  %1015 = vmatprep.subr.mxu0 %v158_v44  ;;  %v509_v17 = vld [vmem:[#allocation2 + $0xd10] sm:$0xff]  ;;  %v506_v19 = vld [vmem:[#allocation2 + $0xcf8] sm:$0xff] }
 0x104   :  { %1086 = vmatprep.subr.mxu1 %v286_v45  ;;  %1016 = vmatpush2.msra.mxu0 %v157_v46  ;;  %v377_v20 = vld [vmem:[#allocation2 + $0x8f0] sm:$0xff]  ;;  %v374_v23 = vld [vmem:[#allocation2 + $0x8d8] sm:$0xff] }
 0x105   :  { %1017 = vmatprep.mubr.f32.mxu0 %v1920_v8  ;;  %1087 = vmatpush2.msra.mxu1 %v285_v47  ;;  %v530_v8 = vld [vmem:[#allocation2 + $0xdb8] sm:$0xff]  ;;  %v505_v22 = vld [vmem:[#allocation2 + $0xcf0] sm:$0xff] }
 0x106   :  { %1018 = vmatmul.mubr.f32.vlgmr.msra.gmra.mxu0 %v1913_v62  ;;  %1088 = vmatprep.mubr.f32.mxu1 %v1924_v11  ;;  %v529_v62 = vld [vmem:[#allocation2 + $0xdb0] sm:$0xff]  ;;  %v526_v11 = vld [vmem:[#allocation2 + $0xd98] sm:$0xff] }
 0x107   :  { %1095 = vmatprep.subr.mxu0 %v410_v48  ;;  %1166 = vmatprep.subr.mxu1 %v538_v49  ;;  %v502_v24 = vld [vmem:[#allocation2 + $0xcd8] sm:$0xff]  ;;  %v373_v25 = vld [vmem:[#allocation2 + $0x8d0] sm:$0xff] }
 0x108   :  { %1089 = vmatmul.mubr.f32.vlgmr.msra.gmra.mxu1 %v1916_v3  ;;  %1096 = vmatpush1.msra.mxu0 %v409_v50  ;;  %v394_v3 = vld [vmem:[#allocation2 + $0x978] sm:$0xff]  ;;  %v501_v27 = vld [vmem:[#allocation2 + $0xcd0] sm:$0xff] }
 0x109   :  { %1167 = vmatpush1.msra.mxu1 %v537_v51  ;;  %1097 = vmatprep.subr.mxu0 %v406_v53  ;;  %v370_v28 = vld [vmem:[#allocation2 + $0x8b8] sm:$0xff]  ;;  %v369_v30 = vld [vmem:[#allocation2 + $0x8b0] sm:$0xff] }
 0x10a   :  { %1168 = vmatprep.subr.mxu1 %v534_v54  ;;  %1098 = vmatpush1.msra.mxu0 %v405_v55  ;;  %v498_v29 = vld [vmem:[#allocation2 + $0xcb8] sm:$0xff]  ;;  %v497_v31 = vld [vmem:[#allocation2 + $0xcb0] sm:$0xff] }
 0x10b   :  { %1169 = vmatpush1.msra.mxu1 %v533_v56  ;;  %1099 = vmatprep.subr.mxu0 %v402_v57  ;;  %v366_v32 = vld [vmem:[#allocation2 + $0x898] sm:$0xff]  ;;  %v365_v34 = vld [vmem:[#allocation2 + $0x890] sm:$0xff] }
 0x10c   :  { %1170 = vmatprep.subr.mxu1 %v530_v8  ;;  %1100 = vmatpush1.msra.mxu0 %v401_v58  ;;  %v494_v33 = vld [vmem:[#allocation2 + $0xc98] sm:$0xff]  ;;  %v493_v35 = vld [vmem:[#allocation2 + $0xc90] sm:$0xff] }
 0x10d   :  { %1171 = vmatpush1.msra.mxu1 %v529_v62  ;;  %1101 = vmatprep.subr.mxu0 %v398_v59  ;;  %v362_v36 = vld [vmem:[#allocation2 + $0x878] sm:$0xff]  ;;  %v361_v38 = vld [vmem:[#allocation2 + $0x870] sm:$0xff] }
 0x10e   :  { %1172 = vmatprep.subr.mxu1 %v526_v11  ;;  %1102 = vmatpush1.msra.mxu0 %v397_v60  ;;  %v490_v37 = vld [vmem:[#allocation2 + $0xc78] sm:$0xff]  ;;  %v489_v39 = vld [vmem:[#allocation2 + $0xc70] sm:$0xff] }
 0x10f   :  { %1173 = vmatpush1.msra.mxu1 %v525_v61  ;;  %1103 = vmatprep.subr.mxu0 %v394_v3  ;;  %v358_v40 = vld [vmem:[#allocation2 + $0x858] sm:$0xff]  ;;  %v357_v43 = vld [vmem:[#allocation2 + $0x850] sm:$0xff] }
 0x110   :  { %1174 = vmatprep.subr.mxu1 %v522_v63  ;;  %1104 = vmatpush1.msra.mxu0 %v393_v0  ;;  %v486_v42 = vld [vmem:[#allocation2 + $0xc58] sm:$0xff]  ;;  %v485_v44 = vld [vmem:[#allocation2 + $0xc50] sm:$0xff] }
 0x111   :  { %1175 = vmatpush1.msra.mxu1 %v521_v1  ;;  %1105 = vmatprep.subr.mxu0 %v390_v2  ;;  %v354_v45 = vld [vmem:[#allocation2 + $0x838] sm:$0xff]  ;;  %v353_v47 = vld [vmem:[#allocation2 + $0x830] sm:$0xff] }
 0x112   :  { %1176 = vmatprep.subr.mxu1 %v518_v4  ;;  %1106 = vmatpush1.msra.mxu0 %v389_v5  ;;  %v482_v46 = vld [vmem:[#allocation2 + $0xc38] sm:$0xff]  ;;  %v481_v48 = vld [vmem:[#allocation2 + $0xc30] sm:$0xff] }
 0x113   :  { %1177 = vmatpush1.msra.mxu1 %v517_v6  ;;  %1107 = vmatprep.subr.mxu0 %v386_v7  ;;  %v350_v49 = vld [vmem:[#allocation2 + $0x818] sm:$0xff]  ;;  %v349_v51 = vld [vmem:[#allocation2 + $0x810] sm:$0xff] }
 0x114   :  { %1178 = vmatprep.subr.mxu1 %v514_v9  ;;  %1108 = vmatpush1.msra.mxu0 %v385_v10  ;;  %v478_v50 = vld [vmem:[#allocation2 + $0xc18] sm:$0xff]  ;;  %v477_v53 = vld [vmem:[#allocation2 + $0xc10] sm:$0xff] }
 0x115   :  { %1179 = vmatpush1.msra.mxu1 %v513_v12  ;;  %1109 = vmatprep.subr.mxu0 %v382_v13  ;;  %v474_v54 = vld [vmem:[#allocation2 + $0xbf8] sm:$0xff]  ;;  %v473_v56 = vld [vmem:[#allocation2 + $0xbf0] sm:$0xff] }
 0x116   :  { %1180 = vmatprep.subr.mxu1 %v510_v14  ;;  %1110 = vmatpush1.msra.mxu0 %v381_v15  ;;  %v602_v55 = vld [vmem:[#allocation2 + $0xff8] sm:$0xff]  ;;  %v601_v57 = vld [vmem:[#allocation2 + $0xff0] sm:$0xff] }
 0x117   :  { %1181 = vmatpush1.msra.mxu1 %v509_v17  ;;  %1111 = vmatprep.subr.mxu0 %v378_v18  ;;  %v470_v8 = vld [vmem:[#allocation2 + $0xbd8] sm:$0xff]  ;;  %v469_v62 = vld [vmem:[#allocation2 + $0xbd0] sm:$0xff] }
 0x118   :  { %1182 = vmatprep.subr.mxu1 %v506_v19  ;;  %1112 = vmatpush1.msra.mxu0 %v377_v20  ;;  %v598_v58 = vld [vmem:[#allocation2 + $0xfd8] sm:$0xff]  ;;  %v597_v59 = vld [vmem:[#allocation2 + $0xfd0] sm:$0xff] }
 0x119   :  { %1183 = vmatpush1.msra.mxu1 %v505_v22  ;;  %1113 = vmatprep.subr.mxu0 %v374_v23  ;;  %v466_v11 = vld [vmem:[#allocation2 + $0xbb8] sm:$0xff]  ;;  %v465_v61 = vld [vmem:[#allocation2 + $0xbb0] sm:$0xff] }
 0x11a   :  { %1184 = vmatprep.subr.mxu1 %v502_v24  ;;  %1114 = vmatpush1.msra.mxu0 %v373_v25  ;;  %v594_v60 = vld [vmem:[#allocation2 + $0xfb8] sm:$0xff]  ;;  %v593_v3 = vld [vmem:[#allocation2 + $0xfb0] sm:$0xff] }
 0x11b   :  { %1185 = vmatpush1.msra.mxu1 %v501_v27  ;;  %1115 = vmatprep.subr.mxu0 %v370_v28  ;;  %v462_v63 = vld [vmem:[#allocation2 + $0xb98] sm:$0xff]  ;;  %v461_v1 = vld [vmem:[#allocation2 + $0xb90] sm:$0xff] }
 0x11c   :  { %1186 = vmatprep.subr.mxu1 %v498_v29  ;;  %1116 = vmatpush1.msra.mxu0 %v369_v30  ;;  %v590_v0 = vld [vmem:[#allocation2 + $0xf98] sm:$0xff]  ;;  %v589_v2 = vld [vmem:[#allocation2 + $0xf90] sm:$0xff] }
 0x11d   :  { %1187 = vmatpush1.msra.mxu1 %v497_v31  ;;  %1117 = vmatprep.subr.mxu0 %v366_v32  ;;  %v458_v4 = vld [vmem:[#allocation2 + $0xb78] sm:$0xff]  ;;  %v457_v6 = vld [vmem:[#allocation2 + $0xb70] sm:$0xff] }
 0x11e   :  { %1188 = vmatprep.subr.mxu1 %v494_v33  ;;  %1118 = vmatpush1.msra.mxu0 %v365_v34  ;;  %v586_v5 = vld [vmem:[#allocation2 + $0xf78] sm:$0xff]  ;;  %v585_v7 = vld [vmem:[#allocation2 + $0xf70] sm:$0xff] }
 0x11f   :  { %1189 = vmatpush1.msra.mxu1 %v493_v35  ;;  %1119 = vmatprep.subr.mxu0 %v362_v36  ;;  %v454_v9 = vld [vmem:[#allocation2 + $0xb58] sm:$0xff]  ;;  %v453_v12 = vld [vmem:[#allocation2 + $0xb50] sm:$0xff] }
 0x120   :  { %1190 = vmatprep.subr.mxu1 %v490_v37  ;;  %1120 = vmatpush1.msra.mxu0 %v361_v38  ;;  %v582_v10 = vld [vmem:[#allocation2 + $0xf58] sm:$0xff]  ;;  %v581_v13 = vld [vmem:[#allocation2 + $0xf50] sm:$0xff] }
 0x121   :  { %1191 = vmatpush1.msra.mxu1 %v489_v39  ;;  %1121 = vmatprep.subr.mxu0 %v358_v40  ;;  %v450_v14 = vld [vmem:[#allocation2 + $0xb38] sm:$0xff]  ;;  %v449_v17 = vld [vmem:[#allocation2 + $0xb30] sm:$0xff] }
 0x122   :  { %1192 = vmatprep.subr.mxu1 %v486_v42  ;;  %1122 = vmatpush1.msra.mxu0 %v357_v43  ;;  %v578_v15 = vld [vmem:[#allocation2 + $0xf38] sm:$0xff]  ;;  %v577_v18 = vld [vmem:[#allocation2 + $0xf30] sm:$0xff] }
 0x123   :  { %1193 = vmatpush1.msra.mxu1 %v485_v44  ;;  %1123 = vmatprep.subr.mxu0 %v354_v45  ;;  %v446_v19 = vld [vmem:[#allocation2 + $0xb18] sm:$0xff]  ;;  %v445_v22 = vld [vmem:[#allocation2 + $0xb10] sm:$0xff] }
 0x124   :  { %1194 = vmatprep.subr.mxu1 %v482_v46  ;;  %1124 = vmatpush1.msra.mxu0 %v353_v47  ;;  %v574_v20 = vld [vmem:[#allocation2 + $0xf18] sm:$0xff]  ;;  %v573_v23 = vld [vmem:[#allocation2 + $0xf10] sm:$0xff] }
 0x125   :  { %1195 = vmatpush1.msra.mxu1 %v481_v48  ;;  %1125 = vmatprep.subr.mxu0 %v350_v49  ;;  %v442_v24 = vld [vmem:[#allocation2 + $0xaf8] sm:$0xff]  ;;  %v441_v27 = vld [vmem:[#allocation2 + $0xaf0] sm:$0xff] }
 0x126   :  { %1196 = vmatprep.subr.mxu1 %v478_v50  ;;  %1126 = vmatpush1.msra.mxu0 %v349_v51  ;;  %v570_v25 = vld [vmem:[#allocation2 + $0xef8] sm:$0xff]  ;;  %v569_v28 = vld [vmem:[#allocation2 + $0xef0] sm:$0xff] }
 0x127   :  { %1197 = vmatpush1.msra.mxu1 %v477_v53  ;;  %1127 = vmatprep.subr.mxu0 %v474_v54  ;;  %v438_v29 = vld [vmem:[#allocation2 + $0xad8] sm:$0xff]  ;;  %v437_v31 = vld [vmem:[#allocation2 + $0xad0] sm:$0xff] }
 0x128   :  { %1198 = vmatprep.subr.mxu1 %v602_v55  ;;  %1128 = vmatpush2.msra.mxu0 %v473_v56  ;;  %v566_v30 = vld [vmem:[#allocation2 + $0xed8] sm:$0xff]  ;;  %v565_v32 = vld [vmem:[#allocation2 + $0xed0] sm:$0xff] }
 0x129   :  { %1199 = vmatpush2.msra.mxu1 %v601_v57  ;;  %1129 = vmatprep.subr.mxu0 %v470_v8  ;;  %v434_v33 = vld [vmem:[#allocation2 + $0xab8] sm:$0xff]  ;;  %v433_v35 = vld [vmem:[#allocation2 + $0xab0] sm:$0xff] }
 0x12a   :  { %1200 = vmatprep.subr.mxu1 %v598_v58  ;;  %1130 = vmatpush2.msra.mxu0 %v469_v62  ;;  %v562_v34 = vld [vmem:[#allocation2 + $0xeb8] sm:$0xff]  ;;  %v561_v36 = vld [vmem:[#allocation2 + $0xeb0] sm:$0xff] }
 0x12b   :  { %1201 = vmatpush2.msra.mxu1 %v597_v59  ;;  %1131 = vmatprep.subr.mxu0 %v466_v11  ;;  %v430_v37 = vld [vmem:[#allocation2 + $0xa98] sm:$0xff]  ;;  %v429_v39 = vld [vmem:[#allocation2 + $0xa90] sm:$0xff]  ;;  %v1277_v11 = vld [vmem:[#allocation7 + $0xe0] sm:$0xff] }
 0x12c   :  { %1202 = vmatprep.subr.mxu1 %v594_v60  ;;  %1132 = vmatpush2.msra.mxu0 %v465_v61  ;;  %v558_v38 = vld [vmem:[#allocation2 + $0xe98] sm:$0xff]  ;;  %v557_v40 = vld [vmem:[#allocation2 + $0xe90] sm:$0xff] }
 0x12d   :  { %1203 = vmatpush2.msra.mxu1 %v593_v3  ;;  %1133 = vmatprep.subr.mxu0 %v462_v63  ;;  %v426_v42 = vld [vmem:[#allocation2 + $0xa78] sm:$0xff]  ;;  %v425_v44 = vld [vmem:[#allocation2 + $0xa70] sm:$0xff] }
 0x12e   :  { %1204 = vmatprep.subr.mxu1 %v590_v0  ;;  %1134 = vmatpush2.msra.mxu0 %v461_v1  ;;  %v554_v43 = vld [vmem:[#allocation2 + $0xe78] sm:$0xff]  ;;  %v553_v45 = vld [vmem:[#allocation2 + $0xe70] sm:$0xff] }
 0x12f   :  { %1205 = vmatpush2.msra.mxu1 %v589_v2  ;;  %1135 = vmatprep.subr.mxu0 %v458_v4  ;;  %v422_v46 = vld [vmem:[#allocation2 + $0xa58] sm:$0xff]  ;;  %v421_v48 = vld [vmem:[#allocation2 + $0xa50] sm:$0xff] }
 0x130   :  { %1206 = vmatprep.subr.mxu1 %v586_v5  ;;  %1136 = vmatpush2.msra.mxu0 %v457_v6  ;;  %v550_v47 = vld [vmem:[#allocation2 + $0xe58] sm:$0xff]  ;;  %v549_v49 = vld [vmem:[#allocation2 + $0xe50] sm:$0xff]  ;;  %v1337_v6 = vld [vmem:[#allocation7 + $0x2c0] sm:$0xff] }
 0x131   :  { %1207 = vmatpush2.msra.mxu1 %v585_v7  ;;  %1137 = vmatprep.subr.mxu0 %v454_v9  ;;  %v418_v50 = vld [vmem:[#allocation2 + $0xa38] sm:$0xff]  ;;  %v417_v53 = vld [vmem:[#allocation2 + $0xa30] sm:$0xff] }
 0x132   :  { %1208 = vmatprep.subr.mxu1 %v582_v10  ;;  %1138 = vmatpush2.msra.mxu0 %v453_v12  ;;  %v546_v51 = vld [vmem:[#allocation2 + $0xe38] sm:$0xff]  ;;  %v545_v54 = vld [vmem:[#allocation2 + $0xe30] sm:$0xff]  ;;  %v1269_v10 = vld [vmem:[#allocation7 + $0xa0] sm:$0xff] }
 0x133   :  { %1209 = vmatpush2.msra.mxu1 %v581_v13  ;;  %1139 = vmatprep.subr.mxu0 %v450_v14  ;;  %v414_v55 = vld [vmem:[#allocation2 + $0xa18] sm:$0xff]  ;;  %v413_v57 = vld [vmem:[#allocation2 + $0xa10] sm:$0xff] }
 0x134   :  { %1210 = vmatprep.subr.mxu1 %v578_v15  ;;  %1140 = vmatpush2.msra.mxu0 %v449_v17  ;;  %v542_v56 = vld [vmem:[#allocation2 + $0xe18] sm:$0xff]  ;;  %v541_v8 = vld [vmem:[#allocation2 + $0xe10] sm:$0xff]  ;;  %v1333_v17 = vld [vmem:[#allocation7 + $0x2a0] sm:$0xff] }
 0x135   :  { %1211 = vmatpush2.msra.mxu1 %v577_v18  ;;  %1141 = vmatprep.subr.mxu0 %v446_v19  ;;  %v1280_v58 = vld [vmem:[#allocation7 + $0xf8] sm:$0xff]  ;;  %v1279_v62 = vld [vmem:[#allocation7 + $0xf0] sm:$0xff]  ;;  %v1278_v59 = vld [vmem:[#allocation7 + $0xe8] sm:$0xff] }
 0x136   :  { %1212 = vmatprep.subr.mxu1 %v574_v20  ;;  %1142 = vmatpush2.msra.mxu0 %v445_v22  ;;  %v1276_v60 = vld [vmem:[#allocation7 + $0xd8] sm:$0xff]  ;;  %v1343_v3 = vld [vmem:[#allocation7 + $0x2f0] sm:$0xff]  ;;  %v1342_v63 = vld [vmem:[#allocation7 + $0x2e8] sm:$0xff] }
 0x137   :  { %1213 = vmatpush2.msra.mxu1 %v573_v23  ;;  %1143 = vmatprep.subr.mxu0 %v442_v24  ;;  %v1344_v61 = vld [vmem:[#allocation7 + $0x2f8] sm:$0xff]  ;;  %v1275_v0 = vld [vmem:[#allocation7 + $0xd0] sm:$0xff]  ;;  %v1274_v1 = vld [vmem:[#allocation7 + $0xc8] sm:$0xff] }
 0x138   :  { %1214 = vmatprep.subr.mxu1 %v570_v25  ;;  %1144 = vmatpush2.msra.mxu0 %v441_v27  ;;  %v1272_v2 = vld [vmem:[#allocation7 + $0xb8] sm:$0xff]  ;;  %v1338_v4 = vld [vmem:[#allocation7 + $0x2c8] sm:$0xff]  ;;  %v1271_v5 = vld [vmem:[#allocation7 + $0xb0] sm:$0xff] }
 0x139   :  { %1215 = vmatpush2.msra.mxu1 %v569_v28  ;;  %1145 = vmatprep.subr.mxu0 %v438_v29  ;;  %v1270_v7 = vld [vmem:[#allocation7 + $0xa8] sm:$0xff]  ;;  %v1336_v9 = vld [vmem:[#allocation7 + $0x2b8] sm:$0xff]  ;;  %v1335_v12 = vld [vmem:[#allocation7 + $0x2b0] sm:$0xff] }
 0x13a   :  { %1216 = vmatprep.subr.mxu1 %v566_v30  ;;  %1146 = vmatpush2.msra.mxu0 %v437_v31  ;;  %v1268_v13 = vld [vmem:[#allocation7 + $0x98] sm:$0xff]  ;;  %v1334_v14 = vld [vmem:[#allocation7 + $0x2a8] sm:$0xff]  ;;  %v1267_v15 = vld [vmem:[#allocation7 + $0x90] sm:$0xff] }
 0x13b   :  { %1217 = vmatpush2.msra.mxu1 %v565_v32  ;;  %1147 = vmatprep.subr.mxu0 %v434_v33  ;;  %v1266_v18 = vld [vmem:[#allocation7 + $0x88] sm:$0xff]  ;;  %v1332_v19 = vld [vmem:[#allocation7 + $0x298] sm:$0xff]  ;;  %v1265_v20 = vld [vmem:[#allocation7 + $0x80] sm:$0xff] }
 0x13c   :  { %1218 = vmatprep.subr.mxu1 %v562_v34  ;;  %1148 = vmatpush2.msra.mxu0 %v433_v35  ;;  %v1331_v22 = vld [vmem:[#allocation7 + $0x290] sm:$0xff]  ;;  %v1264_v23 = vld [vmem:[#allocation7 + $0x78] sm:$0xff]  ;;  %v1330_v24 = vld [vmem:[#allocation7 + $0x288] sm:$0xff] }
 0x13d   :  { %1219 = vmatpush2.msra.mxu1 %v561_v36  ;;  %1149 = vmatprep.subr.mxu0 %v430_v37  ;;  %v1263_v25 = vld [vmem:[#allocation7 + $0x70] sm:$0xff]  ;;  %v1329_v27 = vld [vmem:[#allocation7 + $0x280] sm:$0xff]  ;;  %v1262_v28 = vld [vmem:[#allocation7 + $0x68] sm:$0xff] }
 0x13e   :  { %1220 = vmatprep.subr.mxu1 %v558_v38  ;;  %1150 = vmatpush2.msra.mxu0 %v429_v39  ;;  %v1328_v29 = vld [vmem:[#allocation7 + $0x278] sm:$0xff]  ;;  %v1261_v30 = vld [vmem:[#allocation7 + $0x60] sm:$0xff]  ;;  %v1327_v31 = vld [vmem:[#allocation7 + $0x270] sm:$0xff] }
 0x13f   :  { %1221 = vmatpush2.msra.mxu1 %v557_v40  ;;  %1151 = vmatprep.subr.mxu0 %v426_v42  ;;  %v1260_v32 = vld [vmem:[#allocation7 + $0x58] sm:$0xff]  ;;  %v1326_v33 = vld [vmem:[#allocation7 + $0x268] sm:$0xff]  ;;  %v1259_v34 = vld [vmem:[#allocation7 + $0x50] sm:$0xff] }
 0x140   :  { %1222 = vmatprep.subr.mxu1 %v554_v43  ;;  %1152 = vmatpush2.msra.mxu0 %v425_v44  ;;  %v1325_v35 = vld [vmem:[#allocation7 + $0x260] sm:$0xff]  ;;  %v1258_v36 = vld [vmem:[#allocation7 + $0x48] sm:$0xff]  ;;  %v1324_v37 = vld [vmem:[#allocation7 + $0x258] sm:$0xff] }
 0x141   :  { %1223 = vmatpush2.msra.mxu1 %v553_v45  ;;  %1153 = vmatprep.subr.mxu0 %v422_v46  ;;  %v1257_v38 = vld [vmem:[#allocation7 + $0x40] sm:$0xff]  ;;  %v1323_v39 = vld [vmem:[#allocation7 + $0x250] sm:$0xff]  ;;  %v1256_v40 = vld [vmem:[#allocation7 + $0x38] sm:$0xff] }
 0x142   :  { %1224 = vmatprep.subr.mxu1 %v550_v47  ;;  %1154 = vmatpush2.msra.mxu0 %v421_v48  ;;  %v1322_v42 = vld [vmem:[#allocation7 + $0x248] sm:$0xff]  ;;  %v1255_v43 = vld [vmem:[#allocation7 + $0x30] sm:$0xff]  ;;  %v1321_v44 = vld [vmem:[#allocation7 + $0x240] sm:$0xff] }
 0x143   :  { %1225 = vmatpush2.msra.mxu1 %v549_v49  ;;  %1155 = vmatprep.subr.mxu0 %v418_v50  ;;  %v1254_v45 = vld [vmem:[#allocation7 + $0x28] sm:$0xff]  ;;  %v1320_v46 = vld [vmem:[#allocation7 + $0x238] sm:$0xff]  ;;  %v1253_v47 = vld [vmem:[#allocation7 + $0x20] sm:$0xff] }
 0x144   :  { %1226 = vmatprep.subr.mxu1 %v546_v51  ;;  %1156 = vmatpush2.msra.mxu0 %v417_v53  ;;  %v1319_v48 = vld [vmem:[#allocation7 + $0x230] sm:$0xff]  ;;  %v1252_v49 = vld [vmem:[#allocation7 + $0x18] sm:$0xff]  ;;  %v1318_v50 = vld [vmem:[#allocation7 + $0x228] sm:$0xff] }
 0x145   :  { %1227 = vmatpush2.msra.mxu1 %v545_v54  ;;  %1157 = vmatprep.subr.mxu0 %v414_v55  ;;  %v1251_v51 = vld [vmem:[#allocation7 + $0x10] sm:$0xff]  ;;  %v1317_v53 = vld [vmem:[#allocation7 + $0x220] sm:$0xff]  ;;  %v1250_v54 = vld [vmem:[#allocation7 + $0x8] sm:$0xff] }
 0x146   :  { %1228 = vmatprep.subr.mxu1 %v542_v56  ;;  %1158 = vmatpush2.msra.mxu0 %v413_v57  ;;  %v1316_v55 = vld [vmem:[#allocation7 + $0x218] sm:$0xff]  ;;  %v1249_v56 = vld [vmem:[#allocation7] sm:$0xff]  ;;  %v1315_v57 = vld [vmem:[#allocation7 + $0x210] sm:$0xff] }
 0x147   :  { %1159 = vmatprep.mubr.f32.mxu0 %v1941_v26  ;;  %1229 = vmatpush2.msra.mxu1 %v541_v8  ;;  %v1341_v26 = vld [vmem:[#allocation7 + $0x2e0] sm:$0xff]  ;;  %v1312_v8 = vld [vmem:[#allocation7 + $0x1f8] sm:$0xff] }
 0x148   :  { %1230 = vmatprep.mubr.f32.mxu1 %v1945_v52  ;;  %1160 = vmatmul.mubr.f32.vlgmr.msra.gmra.mxu0 %v1934_v16  ;;  %v1340_v52 = vld [vmem:[#allocation7 + $0x2d8] sm:$0xff]  ;;  %v1273_v16 = vld [vmem:[#allocation7 + $0xc0] sm:$0xff] }
 0x149   :  { %1231 = vmatmul.mubr.f32.vlgmr.msra.gmra.mxu1 %v1937_v21  ;;  %1389 = vmatprep.subr.mxu0 %v1280_v58  ;;  %v1339_v21 = vld [vmem:[#allocation7 + $0x2d0] sm:$0xff]  ;;  %v1314_v58 = vld [vmem:[#allocation7 + $0x208] sm:$0xff] }
 0x14a   :  { %1390 = vmatpush1.msra.mxu0 %v1279_v62  ;;  %1460 = vmatprep.subr.mxu1 %v1344_v61  ;;  %v1311_v62 = vld [vmem:[#allocation7 + $0x1f0] sm:$0xff]  ;;  %v1309_v61 = vld [vmem:[#allocation7 + $0x1e0] sm:$0xff] }
 0x14b   :  { %1391 = vmatprep.subr.mxu0 %v1278_v59  ;;  %1461 = vmatpush1.msra.mxu1 %v1343_v3  ;;  %v1313_v59 = vld [vmem:[#allocation7 + $0x200] sm:$0xff]  ;;  %v1375_v3 = vld [vmem:[#allocation7 + $0x3f0] sm:$0xff] }
 0x14c   :  { %1392 = vmatpush1.msra.mxu0 %v1277_v11  ;;  %1462 = vmatprep.subr.mxu1 %v1342_v63  ;;  %v1310_v11 = vld [vmem:[#allocation7 + $0x1e8] sm:$0xff]  ;;  %v1308_v63 = vld [vmem:[#allocation7 + $0x1d8] sm:$0xff] }
 0x14d   :  { %1393 = vmatprep.subr.mxu0 %v1276_v60  ;;  %1463 = vmatpush1.msra.mxu1 %v1341_v26  ;;  %v1376_v60 = vld [vmem:[#allocation7 + $0x3f8] sm:$0xff]  ;;  %v1307_v26 = vld [vmem:[#allocation7 + $0x1d0] sm:$0xff] }
 0x14e   :  { %1394 = vmatpush1.msra.mxu0 %v1275_v0  ;;  %1464 = vmatprep.subr.mxu1 %v1340_v52  ;;  %v1374_v0 = vld [vmem:[#allocation7 + $0x3e8] sm:$0xff] }
 0x14f   :  { %1395 = vmatprep.subr.mxu0 %v1274_v1  ;;  %1465 = vmatpush1.msra.mxu1 %v1339_v21  ;;  %v1373_v1 = vld [vmem:[#allocation7 + $0x3e0] sm:$0xff]  ;;  %v1306_v52 = vld [vmem:[#allocation7 + $0x1c8] sm:$0xff] }
 0x150   :  { %1396 = vmatpush1.msra.mxu0 %v1273_v16  ;;  %1466 = vmatprep.subr.mxu1 %v1338_v4  ;;  %v1372_v16 = vld [vmem:[#allocation7 + $0x3d8] sm:$0xff]  ;;  %v1305_v21 = vld [vmem:[#allocation7 + $0x1c0] sm:$0xff] }
 0x151   :  { %1397 = vmatprep.subr.mxu0 %v1272_v2  ;;  %1467 = vmatpush1.msra.mxu1 %v1337_v6  ;;  %v1371_v2 = vld [vmem:[#allocation7 + $0x3d0] sm:$0xff]  ;;  %v1304_v4 = vld [vmem:[#allocation7 + $0x1b8] sm:$0xff] }
 0x152   :  { %1398 = vmatpush1.msra.mxu0 %v1271_v5  ;;  %1468 = vmatprep.subr.mxu1 %v1336_v9  ;;  %v1370_v5 = vld [vmem:[#allocation7 + $0x3c8] sm:$0xff]  ;;  %v1303_v6 = vld [vmem:[#allocation7 + $0x1b0] sm:$0xff] }
 0x153   :  { %1399 = vmatprep.subr.mxu0 %v1270_v7  ;;  %1469 = vmatpush1.msra.mxu1 %v1335_v12  ;;  %v1369_v7 = vld [vmem:[#allocation7 + $0x3c0] sm:$0xff]  ;;  %v1302_v9 = vld [vmem:[#allocation7 + $0x1a8] sm:$0xff] }
 0x154   :  { %1400 = vmatpush1.msra.mxu0 %v1269_v10  ;;  %1470 = vmatprep.subr.mxu1 %v1334_v14  ;;  %v1368_v10 = vld [vmem:[#allocation7 + $0x3b8] sm:$0xff]  ;;  %v1301_v12 = vld [vmem:[#allocation7 + $0x1a0] sm:$0xff] }
 0x155   :  { %1401 = vmatprep.subr.mxu0 %v1268_v13  ;;  %1471 = vmatpush1.msra.mxu1 %v1333_v17  ;;  %v1367_v13 = vld [vmem:[#allocation7 + $0x3b0] sm:$0xff]  ;;  %v1300_v14 = vld [vmem:[#allocation7 + $0x198] sm:$0xff] }
 0x156   :  { %1402 = vmatpush1.msra.mxu0 %v1267_v15  ;;  %1472 = vmatprep.subr.mxu1 %v1332_v19  ;;  %v1366_v15 = vld [vmem:[#allocation7 + $0x3a8] sm:$0xff]  ;;  %v1299_v17 = vld [vmem:[#allocation7 + $0x190] sm:$0xff] }
 0x157   :  { %1403 = vmatprep.subr.mxu0 %v1266_v18  ;;  %1473 = vmatpush1.msra.mxu1 %v1331_v22  ;;  %v1365_v18 = vld [vmem:[#allocation7 + $0x3a0] sm:$0xff]  ;;  %v1298_v19 = vld [vmem:[#allocation7 + $0x188] sm:$0xff] }
 0x158   :  { %1404 = vmatpush1.msra.mxu0 %v1265_v20  ;;  %1474 = vmatprep.subr.mxu1 %v1330_v24  ;;  %v1364_v20 = vld [vmem:[#allocation7 + $0x398] sm:$0xff]  ;;  %v1297_v22 = vld [vmem:[#allocation7 + $0x180] sm:$0xff]  ;;  %v607_v24 = vsub.s32 0, %v1904_v41 }
 0x159   :  { %1405 = vmatprep.subr.mxu0 %v1264_v23  ;;  %1475 = vmatpush1.msra.mxu1 %v1329_v27  ;;  %v1363_v23 = vld [vmem:[#allocation7 + $0x390] sm:$0xff]  ;;  %v1362_v27 = vld [vmem:[#allocation7 + $0x388] sm:$0xff] }
 0x15a   :  { %1406 = vmatpush1.msra.mxu0 %v1263_v25  ;;  %1476 = vmatprep.subr.mxu1 %v1328_v29  ;;  %v1296_v25 = vld [vmem:[#allocation7 + $0x178] sm:$0xff]  ;;  %v1295_v29 = vld [vmem:[#allocation7 + $0x170] sm:$0xff] }
 0x15b   :  { %1407 = vmatprep.subr.mxu0 %v1262_v28  ;;  %1477 = vmatpush1.msra.mxu1 %v1327_v31  ;;  %v1960_v28 = vld [vmem:[#allocation5] sm:$0xf]  ;;  %v611_v31 = vsub.s32 1, %v1904_v41 }
 0x15c   :  { %1408 = vmatpush1.msra.mxu0 %v1261_v30  ;;  %1478 = vmatprep.subr.mxu1 %v1326_v33  ;;  %v1361_v30 = vld [vmem:[#allocation7 + $0x380] sm:$0xff]  ;;  %v1360_v33 = vld [vmem:[#allocation7 + $0x378] sm:$0xff] }
 0x15d   :  { %1409 = vmatprep.subr.mxu0 %v1260_v32  ;;  %1479 = vmatpush1.msra.mxu1 %v1325_v35  ;;  %v1294_v32 = vld [vmem:[#allocation7 + $0x168] sm:$0xff]  ;;  %v1293_v35 = vld [vmem:[#allocation7 + $0x160] sm:$0xff] }
 0x15e   :  { %1410 = vmatpush1.msra.mxu0 %v1259_v34  ;;  %1480 = vmatprep.subr.mxu1 %v1324_v37  ;;  %v735_v34 = vpop.f32.mrf.mxu0  ;;  %v608_v37 = vrot.slane %v1960_v28, %v607_v24 }
 0x15f   :  { %1411 = vmatprep.subr.mxu0 %v1258_v36  ;;  %1481 = vmatpush1.msra.mxu1 %v1323_v39  ;;  %v1359_v36 = vld [vmem:[#allocation7 + $0x370] sm:$0xff]  ;;  %v1358_v39 = vld [vmem:[#allocation7 + $0x368] sm:$0xff] }
 0x160   :  { %1412 = vmatpush1.msra.mxu0 %v1257_v38  ;;  %1482 = vmatprep.subr.mxu1 %v1322_v42  ;;  %v1292_v38 = vld [vmem:[#allocation7 + $0x158] sm:$0xff]  ;;  %v1357_v42 = vld [vmem:[#allocation7 + $0x360] sm:$0xff] }
 0x161   :  { %1413 = vmatprep.subr.mxu0 %v1256_v40  ;;  %1483 = vmatpush1.msra.mxu1 %v1321_v44  ;;  %v1291_v40 = vld [vmem:[#allocation7 + $0x150] sm:$0xff]  ;;  %v1290_v44 = vld [vmem:[#allocation7 + $0x148] sm:$0xff] }
 0x162   :  { %1414 = vmatpush1.msra.mxu0 %v1255_v43  ;;  %1484 = vmatprep.subr.mxu1 %v1320_v46  ;;  %v612_v43 = vrot.slane %v1960_v28, %v611_v31  ;;  %v806_v46 = vpop.f32.mrf.mxu1 }
 0x163   :  { %1415 = vmatprep.subr.mxu0 %v1254_v45  ;;  %1485 = vmatpush1.msra.mxu1 %v1319_v48  ;;  %v1356_v45 = vld [vmem:[#allocation7 + $0x358] sm:$0xff]  ;;  %v1289_v48 = vld [vmem:[#allocation7 + $0x140] sm:$0xff] }
 0x164   :  { %1416 = vmatpush1.msra.mxu0 %v1253_v47  ;;  %1486 = vmatprep.subr.mxu1 %v1318_v50  ;;  %v737_v47 = vpop.f32.mrf.mxu0  ;;  %v1288_v50 = vld [vmem:[#allocation7 + $0x138] sm:$0xff] }
 0x165   :  { %1417 = vmatprep.subr.mxu0 %v1252_v49  ;;  %1487 = vmatpush1.msra.mxu1 %v1317_v53  ;;  %v736_v49 = vadd.f32 %v735_v34, %v608_v37  ;;  %v738_v53 = vadd.f32 %v737_v47, %v612_v43  ;;  %v1559_v34 = vld [vmem:[%s2081_s5 + $0xd0] sm:$0xff]  ;;  %v1542_v37 = vld [vmem:[%s2081_s5 + $0x48] sm:$0xff]  ;;  %v1553_v47 = vld [vmem:[%s2081_s5 + $0xa0] sm:$0xff] }
 0x166   :  { %1418 = vmatpush1.msra.mxu0 %v1251_v51  ;;  %1488 = vmatprep.subr.mxu1 %v1316_v55  ;;  %v1287_v51 = vld [vmem:[#allocation7 + $0x130] sm:$0xff]  ;;  %v808_v55 = vpop.f32.mrf.mxu1 }
 0x167   :  { %1419 = vmatprep.subr.mxu0 %v1250_v54  ;;  %1489 = vmatpush1.msra.mxu1 %v1315_v57  ;;  %v1286_v54 = vld [vmem:[#allocation7 + $0x128] sm:$0xff]  ;;  %v807_v57 = vadd.f32 %v806_v46, %v736_v49  ;;  %v615_v49 = vsub.s32 2, %v1904_v41 }
 0x168   :  { %1420 = vmatpush1.msra.mxu0 %v1249_v56  ;;  %1490 = vmatprep.subr.mxu1 %v1314_v58  ;;  %v1285_v56 = vld [vmem:[#allocation7 + $0x120] sm:$0xff]  ;;  %v1555_v43 = vld [vmem:[%s2081_s5 + $0xb0] sm:$0xff] }
 0x169   :  { %1421 = vmatprep.subr.mxu0 %v1312_v8  ;;  %1491 = vmatpush1.msra.mxu1 %v1313_v59  ;;  %v1284_v8 = vld [vmem:[#allocation7 + $0x118] sm:$0xff]  ;;  %v809_v59 = vadd.f32 %v808_v55, %v738_v53  ;;  %v1538_v46 = vld [vmem:[%s2081_s5 + $0x28] sm:$0xff]  ;;  %v616_v53 = vrot.slane %v1960_v28, %v615_v49 }
 0x16a   :  { %1422 = vmatpush2.msra.mxu0 %v1311_v62  ;;  %1492 = vmatprep.subr.mxu1 %v1376_v60  ;;  %v1283_v62 = vld [vmem:[#allocation7 + $0x110] sm:$0xff]  ;;  %v1282_v60 = vld [vmem:[#allocation7 + $0x108] sm:$0xff] }
 0x16b   :  { %1423 = vmatprep.subr.mxu0 %v1310_v11  ;;  %1493 = vmatpush2.msra.mxu1 %v1375_v3 }
 0x16c   :  { %1424 = vmatpush2.msra.mxu0 %v1309_v61  ;;  %1494 = vmatprep.subr.mxu1 %v1374_v0 }
 0x16d   :  { %1425 = vmatprep.subr.mxu0 %v1308_v63  ;;  %1495 = vmatpush2.msra.mxu1 %v1373_v1  ;;  %v1281_v63 = vld [vmem:[#allocation7 + $0x100] sm:$0xff] }
 0x16e   :  { %1426 = vmatpush2.msra.mxu0 %v1307_v26  ;;  %1496 = vmatprep.subr.mxu1 %v1372_v16 }
 0x16f   :  { %1427 = vmatprep.subr.mxu0 %v1306_v52  ;;  %1497 = vmatpush2.msra.mxu1 %v1371_v2  ;;  %v1355_v52 = vld [vmem:[#allocation7 + $0x350] sm:$0xff] }
 0x170   :  { %1428 = vmatpush2.msra.mxu0 %v1305_v21  ;;  %1498 = vmatprep.subr.mxu1 %v1370_v5  ;;  %v1354_v21 = vld [vmem:[#allocation7 + $0x348] sm:$0xff] }
 0x171   :  { %1429 = vmatprep.subr.mxu0 %v1304_v4  ;;  %1499 = vmatpush2.msra.mxu1 %v1369_v7  ;;  %v1353_v4 = vld [vmem:[#allocation7 + $0x340] sm:$0xff]  ;;  %v1351_v7 = vld [vmem:[#allocation7 + $0x330] sm:$0xff] }
 0x172   :  { %1430 = vmatpush2.msra.mxu0 %v1303_v6  ;;  %1500 = vmatprep.subr.mxu1 %v1368_v10  ;;  %v1352_v6 = vld [vmem:[#allocation7 + $0x338] sm:$0xff]  ;;  %v1350_v10 = vld [vmem:[#allocation7 + $0x328] sm:$0xff] }
 0x173   :  { %1431 = vmatprep.subr.mxu0 %v1302_v9  ;;  %1501 = vmatpush2.msra.mxu1 %v1367_v13  ;;  %v1349_v13 = vld [vmem:[#allocation7 + $0x320] sm:$0xff] }
 0x174   :  { %1432 = vmatpush2.msra.mxu0 %v1301_v12  ;;  %1502 = vmatprep.subr.mxu1 %v1366_v15  ;;  %v1347_v15 = vld [vmem:[#allocation7 + $0x310] sm:$0xff] }
 0x175   :  { %1433 = vmatprep.subr.mxu0 %v1300_v14  ;;  %1503 = vmatpush2.msra.mxu1 %v1365_v18  ;;  %v1348_v14 = vld [vmem:[#allocation7 + $0x318] sm:$0xff]  ;;  %v1345_v18 = vld [vmem:[#allocation7 + $0x300] sm:$0xff] }
 0x176   :  { %1434 = vmatpush2.msra.mxu0 %v1299_v17  ;;  %1504 = vmatprep.subr.mxu1 %v1364_v20  ;;  %v1346_v17 = vld [vmem:[#allocation7 + $0x308] sm:$0xff]  ;;  %v1548_v20 = vld [vmem:[%s2081_s5 + $0x78] sm:$0xff] }
 0x177   :  { %1435 = vmatprep.subr.mxu0 %v1298_v19  ;;  %1505 = vmatpush2.msra.mxu1 %v1363_v23  ;;  %v1564_v19 = vld [vmem:[%s2081_s5 + $0xf8] sm:$0xff]  ;;  %v1547_v23 = vld [vmem:[%s2081_s5 + $0x70] sm:$0xff] }
 0x178   :  { %1436 = vmatpush2.msra.mxu0 %v1297_v22  ;;  %1506 = vmatprep.subr.mxu1 %v1362_v27  ;;  %v1563_v22 = vld [vmem:[%s2081_s5 + $0xf0] sm:$0xff]  ;;  %v1546_v27 = vld [vmem:[%s2081_s5 + $0x68] sm:$0xff] }
 0x179   :  { %1437 = vmatprep.subr.mxu0 %v1296_v25  ;;  %1507 = vmatpush2.msra.mxu1 %v1361_v30  ;;  %v1562_v25 = vld [vmem:[%s2081_s5 + $0xe8] sm:$0xff]  ;;  %v1545_v30 = vld [vmem:[%s2081_s5 + $0x60] sm:$0xff] }
 0x17a   :  { %1438 = vmatpush2.msra.mxu0 %v1295_v29  ;;  %1508 = vmatprep.subr.mxu1 %v1360_v33  ;;  %v1561_v29 = vld [vmem:[%s2081_s5 + $0xe0] sm:$0xff]  ;;  %v1544_v33 = vld [vmem:[%s2081_s5 + $0x58] sm:$0xff] }
 0x17b   :  { %1439 = vmatprep.subr.mxu0 %v1294_v32  ;;  %1509 = vmatpush2.msra.mxu1 %v1359_v36  ;;  %v1560_v32 = vld [vmem:[%s2081_s5 + $0xd8] sm:$0xff]  ;;  %v1558_v36 = vld [vmem:[%s2081_s5 + $0xc8] sm:$0xff] }
 0x17c   :  { %1440 = vmatpush2.msra.mxu0 %v1293_v35  ;;  %1510 = vmatprep.subr.mxu1 %v1358_v39  ;;  %v1543_v35 = vld [vmem:[%s2081_s5 + $0x50] sm:$0xff]  ;;  %v1541_v39 = vld [vmem:[%s2081_s5 + $0x40] sm:$0xff] }
 0x17d   :  { %1441 = vmatprep.subr.mxu0 %v1292_v38  ;;  %1511 = vmatpush2.msra.mxu1 %v1357_v42  ;;  %v1557_v38 = vld [vmem:[%s2081_s5 + $0xc0] sm:$0xff]  ;;  %v1540_v42 = vld [vmem:[%s2081_s5 + $0x38] sm:$0xff] }
 0x17e   :  { %1442 = vmatpush2.msra.mxu0 %v1291_v40  ;;  %1512 = vmatprep.subr.mxu1 %v1356_v45  ;;  %v1556_v40 = vld [vmem:[%s2081_s5 + $0xb8] sm:$0xff]  ;;  %v1554_v45 = vld [vmem:[%s2081_s5 + $0xa8] sm:$0xff] }
 0x17f   :  { %1443 = vmatprep.subr.mxu0 %v1290_v44  ;;  %1513 = vmatpush2.msra.mxu1 %v1355_v52  ;;  %v1539_v44 = vld [vmem:[%s2081_s5 + $0x30] sm:$0xff] }
 0x180   :  { %1444 = vmatpush2.msra.mxu0 %v1289_v48  ;;  %1514 = vmatprep.subr.mxu1 %v1354_v21  ;;  %v1537_v48 = vld [vmem:[%s2081_s5 + $0x20] sm:$0xff] }
 0x181   :  { %1445 = vmatprep.subr.mxu0 %v1288_v50  ;;  %1515 = vmatpush2.msra.mxu1 %v1353_v4  ;;  %v619_v50 = vsub.s32 3, %v1904_v41  ;;  %v1536_v4 = vld [vmem:[%s2081_s5 + $0x18] sm:$0xff] }
 0x182   :  { %1446 = vmatpush2.msra.mxu0 %v1287_v51  ;;  %1516 = vmatprep.subr.mxu1 %v1352_v6  ;;  %v1535_v6 = vld [vmem:[%s2081_s5 + $0x10] sm:$0xff] }
 0x183   :  { %1447 = vmatprep.subr.mxu0 %v1286_v54  ;;  %1517 = vmatpush2.msra.mxu1 %v1351_v7  ;;  %v620_v54 = vrot.slane %v1960_v28, %v619_v50  ;;  %v1550_v7 = vld [vmem:[%s2081_s5 + $0x88] sm:$0xff] }
 0x184   :  { %v877_v58 = vpop.f32.mrf.mxu0  ;;  %1448 = vmatpush2.msra.mxu0 %v1285_v56  ;;  %1518 = vmatprep.subr.mxu1 %v1350_v10  ;;  %v1549_v10 = vld [vmem:[%s2081_s5 + $0x80] sm:$0xff] }
 0x185   :  { %v878_v11 = vadd.f32 %v877_v58, %v807_v57  ;;  %1449 = vmatprep.subr.mxu0 %v1284_v8  ;;  %1519 = vmatpush2.msra.mxu1 %v1349_v13  ;;  %v1377_v13 = vld [vmem:[#allocation8] sm:$0x3] }
 0x186   :  { %v948_v61 = vpop.f32.mrf.mxu1  ;;  %v879_v3 = vpop.f32.mrf.mxu0  ;;  %1450 = vmatpush2.msra.mxu0 %v1283_v62  ;;  %1520 = vmatprep.subr.mxu1 %v1348_v14 }
 0x187   :  { %v949_v0 = vadd.f32 %v948_v61, %v878_v11  ;;  %v880_v26 = vadd.f32 %v879_v3, %v809_v59  ;;  %1451 = vmatprep.subr.mxu0 %v1282_v60  ;;  %1521 = vmatpush2.msra.mxu1 %v1347_v15  ;;  %v1382_v15 = vrot.slane %v1377_v13, %v607_v24 }
 0x188   :  { %v950_v1 = vpop.f32.mrf.mxu1  ;;  %1452 = vmatpush2.msra.mxu0 %v1281_v63  ;;  %1522 = vmatprep.subr.mxu1 %v1346_v17  ;;  %v1386_v17 = vrot.slane %v1377_v13, %v611_v31 }
 0x189   :  { %v951_v16 = vadd.f32 %v950_v1, %v880_v26  ;;  %v1241_v2 = vmul.f32 0.01, %v949_v0  ;;  %vm1237_vm0 = vcmp.gt.f32.partialorder %v949_v0, 0.0  ;;  %1523 = vmatpush2.msra.mxu1 %v1345_v18  ;;  %1662 = vmatprep.subr.mxu0 %v1564_v19 }
 0x18b   :  { %v1242_v5 = vmul.f32 0.01, %v951_v16  ;;  %vm1238_vm1 = vcmp.gt.f32.partialorder %v951_v16, 0.0  ;;  %v1245_v12 = vsel %vm1237_vm0, %v949_v0, %v1241_v2  ;;  %v1552_v2 = vld [vmem:[%s2081_s5 + $0x98] sm:$0xff] }
 0x18d   :  { %v1246_v9 = vsel %vm1238_vm1, %v951_v16, %v1242_v5  ;;  %v1551_v5 = vld [vmem:[%s2081_s5 + $0x90] sm:$0xff] }
 0x18e   :  { %1453 = vmatprep.mubr.f32.mxu0 %v1246_v9  ;;  %v1534_v9 = vld [vmem:[%s2081_s5 + $0x8] sm:$0xff] }
 0x18f   :  { %1454 = vmatmul.mubr.f32.vlgmr.msra.gmra.mxu0 %v1245_v12  ;;  %v1533_v12 = vld [vmem:[%s2081_s5] sm:$0xff]  ;;  %s1848_s5 = smov [#allocation11]  }
 0x190   :  { %1663 = vmatpush3.msra.mxu0 %v1548_v20  ;;  %s1650_s12 = sshll.u32 %s1848_s5, 4  ;;  %s1651_s12 = int_to_ptr.vmem [resolvable:$true] %s1650_s12 }
 0x191   :  { %1664 = vmatprep.subr.mxu0 %v1563_v22  ;;  %s1810_s13 = scalar_lea.vmem %s1651_s12, 32  ;;  %p1815_p12 = scmp.lt.s32.totalorder %s1651_s12, %s1651_s12 }
 0x192   :  { %1665 = vmatpush3.msra.mxu0 %v1547_v23  ;;  %p1811_p11 = scmp.ne.s32.totalorder %s1651_s12, %s1810_s13  ;;  %p1816_p13 = scmp.lt.s32.totalorder %s1810_s13, %s1810_s13 }
 0x193   :  { %1666 = vmatprep.subr.mxu0 %v1562_v25 }
 0x194   :  { %1667 = vmatpush3.msra.mxu0 %v1546_v27  ;;  %p1817_p0 = por %p1816_p13, %p1815_p12 }
 0x195   :  { %1668 = vmatprep.subr.mxu0 %v1561_v29 }
 0x196   :  { %1669 = vmatpush3.msra.mxu0 %v1545_v30  ;;  %p1818_p1 = pnand %p1817_p0, %p1811_p11 }
 0x197   :  { %1670 = vmatprep.subr.mxu0 %v1560_v32 }
 0x198   :  { %1671 = vmatpush3.msra.mxu0 %v1544_v33  ;;  %v1661_v33 = vld [vmem:[#allocation10] ss:$0 sm:$0xff] }
 0x199   :  { %1672 = vmatprep.subr.mxu0 %v1559_v34 }
 0x19a   :  { %1673 = vmatpush3.msra.mxu0 %v1543_v35 }
 0x19b   :  { %1674 = vmatprep.subr.mxu0 %v1558_v36 }
 0x19c   :  { %1675 = vmatpush3.msra.mxu0 %v1542_v37 }
 0x19d   :  { %1676 = vmatprep.subr.mxu0 %v1557_v38 }
 0x19e   :  { %1677 = vmatpush3.msra.mxu0 %v1541_v39 }
 0x19f   :  { %1678 = vmatprep.subr.mxu0 %v1556_v40 }
 0x1a0   :  { %1679 = vmatpush3.msra.mxu0 %v1540_v42 }
 0x1a1   :  { %1680 = vmatprep.subr.mxu0 %v1555_v43 }
 0x1a2   :  { %1681 = vmatpush3.msra.mxu0 %v1539_v44 }
 0x1a3   :  { %1682 = vmatprep.subr.mxu0 %v1554_v45 }
 0x1a4   :  { %1683 = vmatpush3.msra.mxu0 %v1538_v46 }
 0x1a5   :  { %1684 = vmatprep.subr.mxu0 %v1553_v47 }
 0x1a6   :  { %1685 = vmatpush3.msra.mxu0 %v1537_v48 }
 0x1a7   :  { %1686 = vmatprep.subr.mxu0 %v1552_v2 }
 0x1a8   :  { %1687 = vmatpush3.msra.mxu0 %v1536_v4 }
 0x1a9   :  { %1688 = vmatprep.subr.mxu0 %v1551_v5 }
 0x1aa   :  { %1689 = vmatpush3.msra.mxu0 %v1535_v6 }
 0x1ab   :  { %1690 = vmatprep.subr.mxu0 %v1550_v7 }
 0x1ac   :  { %1691 = vmatpush3.msra.mxu0 %v1534_v9 }
 0x1ad   :  { %1692 = vmatprep.subr.mxu0 %v1549_v10 }
 0x1ae   :  { %1693 = vmatpush3.msra.mxu0 %v1533_v12 }
 0x1c6   :  { %v1019_v51 = vpop.f32.mrf.mxu0 }
 0x1c7   :  { %v1020_v57 = vadd.f32 %v1019_v51, %v616_v53 }
 0x1c8   :  { %v1090_v55 = vpop.f32.mrf.mxu1  ;;  %v1021_v56 = vpop.f32.mrf.mxu0 }
 0x1c9   :  { %v1022_v8 = vadd.f32 %v1021_v56, %v620_v54  ;;  %v1091_v62 = vadd.f32 %v1090_v55, %v1020_v57 }
 0x1ca   :  { %v1092_v58 = vpop.f32.mrf.mxu1 }
 0x1cb   :  { %v1093_v60 = vadd.f32 %v1092_v58, %v1022_v8 }
 0x208   :  { %v1161_v59 = vpop.f32.mrf.mxu0 }
 0x209   :  { %v1232_v11 = vpop.f32.mrf.mxu1  ;;  %v1162_v61 = vadd.f32 %v1161_v59, %v1091_v62 }
 0x20a   :  { %v1163_v3 = vpop.f32.mrf.mxu0 }
 0x20b   :  { %v1233_v63 = vadd.f32 %v1232_v11, %v1162_v61  ;;  %v1164_v0 = vadd.f32 %v1163_v3, %v1093_v60  ;;  %v1234_v26 = vpop.f32.mrf.mxu1 }
 0x20d   :  { %v1235_v1 = vadd.f32 %v1234_v26, %v1164_v0  ;;  %v1243_v52 = vmul.f32 0.01, %v1233_v63  ;;  %vm1239_vm2 = vcmp.gt.f32.partialorder %v1233_v63, 0.0 }
 0x20f   :  { %v1244_v16 = vmul.f32 0.01, %v1235_v1  ;;  %vm1240_vm3 = vcmp.gt.f32.partialorder %v1235_v1, 0.0  ;;  %v1247_v21 = vsel %vm1239_vm2, %v1233_v63, %v1243_v52 }
 0x211   :  { %v1248_v28 = vsel %vm1240_vm3, %v1235_v1, %v1244_v16 }
 0x212   :  { %1524 = vmatprep.mubr.f32.mxu1 %v1248_v28 }
 0x213   :  { %1525 = vmatmul.mubr.f32.vlgmr.msra.gmra.mxu1 %v1247_v21 }
 0x24f   :  { %v1455_v14 = vpop.f32.mrf.mxu0 }
 0x250   :  { %v1456_v19 = vadd.f32 %v1455_v14, %v1382_v15 }
 0x251   :  { %v1457_v18 = vpop.f32.mrf.mxu0 }
 0x252   :  { %v1458_v22 = vadd.f32 %v1457_v18, %v1386_v17 }
 0x2d3   :  { %v1526_v20 = vpop.f32.mrf.mxu1 }
 0x2d4   :  { %v1527_v23 = vadd.f32 %v1526_v20, %v1456_v19 }
 0x2d5   :  { %v1528_v25 = vpop.f32.mrf.mxu1 }
 0x2d6   :  { %v1529_v27 = vadd.f32 %v1528_v25, %v1458_v22  ;;  %v1531_v30 = vmax.f32 %v1527_v23, 0.0 }
 0x2d8   :  { %v1532_v29 = vmax.f32 %v1529_v27, 0.0 }
 0x2da   :  { %1636 = vmatprep.mubr.f32.mxu0 %v1532_v29 }
 0x2db   :  { %1637 = vmatmul.mubr.f32.vlgmr.msra.gmra.mxu0 %v1531_v30 }
 0x39b   :  { %v1694_v32 = vpop.f32.mrf.mxu0 }
 0x39d   :  { %v1695_v34 = vpop.f32.mrf.mxu0 }
 0x39e   :  { %v1696_v24 = vadd.f32 %v1695_v34, %v1694_v32 }
 0x3a0   :  { %v1639_v41 = vadd.f32 %v1696_v24, %v1661_v33 }
 0x3a2   :  { %1643 = vst.msk [vmem:[#allocation11] sm:$0x3] %vm1642_vm4, %v1639_v41 }
 0x3a3   :  { %1821 = shalt.err (!%p1818_p1)
}
 0x3a4   :  { %1653 = dma.vmem_to_hbm [thread:$0]  %s1651_s12, 32, %s2083_s7, [#allocation4]  }
 0x3a5   :  { %1836 = dma.done.wait [#allocation4], 32  }
 0x3a6   :  { %1837 = vsyncadd [#allocation4], 4294967264 }
 0x3a7   :  { %1657 = vsyncpa [#allocation3], 1 }
 0x3a8   :  { %1658 = vsyncpa [#allocation6], 1 }
 0x3a9   :  { %1659 = vsyncpa [#allocation9], 1 }
 0x3aa   :  { %1660 = vsyncpa [#allocation4], 1 }

</bundles_post_ra>
